<compile_context>
chip_gen: v7x
topology: tpu7x:2x2x1
jax: 0.10.0
libtpu: 0.0.40
codegen_flags: <defaults>
</compile_context>

<pallas_src>
import functools

import jax
import jax.numpy as jnp
from jax import lax
from jax.experimental import pallas as pl
from jax.experimental.pallas import tpu as pltpu


# ---------------------------------------------------------------------------
# helpers
# ---------------------------------------------------------------------------
def _vmem_limit_bytes():
    """Generation-aware scoped-VMEM limit (leave headroom for double-buffering)."""
    try:
        cap = int(pltpu.get_tpu_info().vmem_capacity_bytes)
    except Exception:
        cap = 64 * 1024 * 1024  # conservative (v7x physical)
    return min((cap * 3) // 4, 100 * 1024 * 1024)


_VMEM_LIMIT = _vmem_limit_bytes()


def _tile(dim, target, aligns=(128, 8, 1)):
    """Largest divisor of `dim` <= `target`, preferring 128-, then 8-aligned."""
    if dim <= target:
        return dim
    for align in aligns:
        t = (target // align) * align
        while t >= align:
            if dim % t == 0:
                return t
            t -= align
    return dim


def _bf16(a):
    return a.astype(jnp.bfloat16)


# ---------------------------------------------------------------------------
# Tiled linear: bias (+ optional GELU, + optional fused residual add)
#   residual may have fewer rows than x (e.g. a per-token pos-embedding shared
#   across the batch); it is streamed with a modulo index_map.
# ---------------------------------------------------------------------------
def _tiled_linear_kernel(*refs, activation, has_residual):
    if has_residual:
        x_ref, w_ref, b_ref, res_ref, o_ref, acc_ref = refs
    else:
        x_ref, w_ref, b_ref, o_ref, acc_ref = refs
        res_ref = None
    k = pl.program_id(2)

    @pl.when(k == 0)
    def _init():
        acc_ref[...] = jnp.zeros_like(acc_ref)

    acc_ref[...] += jnp.dot(x_ref[...], w_ref[...],
                            preferred_element_type=jnp.float32)

    @pl.when(k == pl.num_programs(2) - 1)
    def _finalize():
        y = acc_ref[...] + b_ref[...]
        if activation == "gelu":
            # TODO(synk): PyTorch nn.GELU default is the exact erf form; the
            # tanh approximation is used here (EUP-friendly on TPU).
            y = jax.nn.gelu(y, approximate=True)
        if has_residual:
            y = y + res_ref[...].astype(jnp.float32)
        o_ref[...] = y.astype(o_ref.dtype)


def linear(x, w, b, residual=None, activation=None, *, tm=512, tn=512, tk=1024):
    """bf16 x:(M,K) @ bf16 w:(K,N) + b:(N,) [+ residual] -> bf16 (M,N)."""
    M, K = x.shape
    N = w.shape[1]
    res_rows = residual.shape[0] if residual is not None else M
    # res_rows is either M or a divisor period of M (e.g. tokens-per-batch for
    # a shared pos-embedding); pick tm from its divisors so both are tiled.
    tm = _tile(res_rows, tm)
    tn = _tile(N, tn)
    tk = _tile(K, tk)
    grid = (M // tm, N // tn, K // tk)
    res_blocks = res_rows // tm

    in_specs = [
        pl.BlockSpec((tm, tk), lambda i, j, k: (i, k)),
        pl.BlockSpec((tk, tn), lambda i, j, k: (k, j)),
        pl.BlockSpec((1, tn), lambda i, j, k: (0, j)),
    ]
    args = [x, w, b.reshape(1, N).astype(jnp.float32)]
    if residual is not None:
        in_specs.append(
            pl.BlockSpec((tm, tn), lambda i, j, k, rb=res_blocks: (i % rb, j)))
        args.append(residual)

    return pl.pallas_call(
        functools.partial(_tiled_linear_kernel, activation=activation,
                          has_residual=residual is not None),
        out_shape=jax.ShapeDtypeStruct((M, N), jnp.bfloat16),
        grid=grid,
        in_specs=in_specs,
        out_specs=pl.BlockSpec((tm, tn), lambda i, j, k: (i, j)),
        scratch_shapes=[pltpu.VMEM((tm, tn), jnp.float32)],
        compiler_params=pltpu.CompilerParams(
            dimension_semantics=("parallel", "parallel", "arbitrary"),
            vmem_limit_bytes=_VMEM_LIMIT),
    )(*args)


# ---------------------------------------------------------------------------
# LayerNorm fused into the following matmul (+ optional GELU)
#   LN result is cached in a bf16 VMEM scratch at j==0 and reused for all
#   output-column tiles j>0 (j is the inner, "arbitrary" grid axis).
# ---------------------------------------------------------------------------
def _ln_linear_kernel(x_ref, g_ref, bln_ref, w_ref, b_ref, o_ref, y_ref, *,
                      activation, eps):
    j = pl.program_id(1)

    @pl.when(j == 0)
    def _compute_ln():
        x = x_ref[...].astype(jnp.float32)                    # (tm, K)
        mean = jnp.mean(x, axis=-1, keepdims=True)
        var = jnp.mean(jnp.square(x - mean), axis=-1, keepdims=True)
        y = (x - mean) * lax.rsqrt(var + eps) * g_ref[...] + bln_ref[...]
        y_ref[...] = y.astype(jnp.bfloat16)

    acc = jnp.dot(y_ref[...], w_ref[...], preferred_element_type=jnp.float32)
    acc = acc + b_ref[...]
    if activation == "gelu":
        acc = jax.nn.gelu(acc, approximate=True)
    o_ref[...] = acc.astype(o_ref.dtype)


def ln_linear(x, ln_g, ln_b, w, b, activation=None, *, tm=512, tn=512, eps=1e-6):
    # TODO(synk): eps should follow the pretrained HF config (PyTorch LN default
    # is 1e-5); parameterized here, 1e-6 used for the synthetic backbone.
    M, K = x.shape
    N = w.shape[1]
    tm, tn = _tile(M, tm), _tile(N, tn)
    grid = (M // tm, N // tn)
    return pl.pallas_call(
        functools.partial(_ln_linear_kernel, activation=activation, eps=eps),
        out_shape=jax.ShapeDtypeStruct((M, N), jnp.bfloat16),
        grid=grid,
        in_specs=[
            pl.BlockSpec((tm, K), lambda i, j: (i, 0)),
            pl.BlockSpec((1, K), lambda i, j: (0, 0)),
            pl.BlockSpec((1, K), lambda i, j: (0, 0)),
            pl.BlockSpec((K, tn), lambda i, j: (0, j)),
            pl.BlockSpec((1, tn), lambda i, j: (0, j)),
        ],
        out_specs=pl.BlockSpec((tm, tn), lambda i, j: (i, j)),
        scratch_shapes=[pltpu.VMEM((tm, K), jnp.bfloat16)],
        compiler_params=pltpu.CompilerParams(
            dimension_semantics=("parallel", "arbitrary"),
            vmem_limit_bytes=_VMEM_LIMIT),
    )(x, ln_g.reshape(1, K).astype(jnp.float32),
      ln_b.reshape(1, K).astype(jnp.float32),
      w, b.reshape(1, N).astype(jnp.float32))


# ---------------------------------------------------------------------------
# Flash-style multi-head self-attention
#   q, k, v: (B*heads, N, Dh) bf16.  Grid (B*heads, q_tiles, kv_tiles); kv axis
#   is an online-softmax reduction with (tq,1)/(tq,Dh) f32 scratch.
# ---------------------------------------------------------------------------
def _flash_attn_kernel(q_ref, k_ref, v_ref, o_ref, m_ref, l_ref, acc_ref, *,
                       scale):
    ki = pl.program_id(2)

    @pl.when(ki == 0)
    def _init():
        m_ref[...] = jnp.full_like(m_ref, -jnp.inf)
        l_ref[...] = jnp.zeros_like(l_ref)
        acc_ref[...] = jnp.zeros_like(acc_ref)

    q = q_ref[0] * scale                                      # (tq, Dh) bf16
    k = k_ref[0]                                              # (tkv, Dh) bf16
    v = v_ref[0]                                              # (tkv, Dh) bf16
    # MXU consumes K un-transposed: contract the head_dim axes directly.
    s = lax.dot_general(q, k, (((1,), (1,)), ((), ())),
                        preferred_element_type=jnp.float32)   # (tq, tkv) f32

    m_prev = m_ref[...]                                       # (tq, 1)
    m_new = jnp.maximum(m_prev, jnp.max(s, axis=-1, keepdims=True))
    alpha = jnp.exp(m_prev - m_new)
    p = jnp.exp(s - m_new)                                    # unnormalized
    l_ref[...] = alpha * l_ref[...] + jnp.sum(p, axis=-1, keepdims=True)
    acc_ref[...] = alpha * acc_ref[...] + jnp.dot(
        p.astype(v.dtype), v, preferred_element_type=jnp.float32)
    m_ref[...] = m_new

    @pl.when(ki == pl.num_programs(2) - 1)
    def _finalize():
        inv = pl.reciprocal(l_ref[...], approx=True)
        o_ref[0] = (acc_ref[...] * inv).astype(o_ref.dtype)


def attention(q, k, v, *, tq=256, tkv=512):
    """q,k,v: (B*heads, N, Dh) bf16 -> (B*heads, N, Dh) bf16."""
    BH, N, Dh = q.shape
    tq = _tile(N, tq)
    tkv = _tile(N, tkv)
    scale = 1.0 / (Dh ** 0.5)
    grid = (BH, N // tq, N // tkv)
    return pl.pallas_call(
        functools.partial(_flash_attn_kernel, scale=scale),
        out_shape=jax.ShapeDtypeStruct((BH, N, Dh), jnp.bfloat16),
        grid=grid,
        in_specs=[
            pl.BlockSpec((1, tq, Dh), lambda b, qi, ki: (b, qi, 0)),
            pl.BlockSpec((1, tkv, Dh), lambda b, qi, ki: (b, ki, 0)),
            pl.BlockSpec((1, tkv, Dh), lambda b, qi, ki: (b, ki, 0)),
        ],
        out_specs=pl.BlockSpec((1, tq, Dh), lambda b, qi, ki: (b, qi, 0)),
        scratch_shapes=[
            pltpu.VMEM((tq, 1), jnp.float32),    # running max
            pltpu.VMEM((tq, 1), jnp.float32),    # running denom
            pltpu.VMEM((tq, Dh), jnp.float32),   # output accumulator
        ],
        compiler_params=pltpu.CompilerParams(
            dimension_semantics=("parallel", "parallel", "arbitrary"),
            vmem_limit_bytes=_VMEM_LIMIT),
    )(q, k, v)


# ---------------------------------------------------------------------------
# Final LayerNorm + token mean-pool + classifier, tiled over token blocks
# with a (B, D) f32 partial-sum accumulator.
# ---------------------------------------------------------------------------
def _ln_pool_cls_kernel(x_ref, g_ref, b_ref, w_ref, cb_ref, o_ref, acc_ref, *,
                        eps, n_tokens):
    t = pl.program_id(0)

    @pl.when(t == 0)
    def _init():
        acc_ref[...] = jnp.zeros_like(acc_ref)

    x = x_ref[...].astype(jnp.float32)                        # (B, tn, D)
    mean = jnp.mean(x, axis=-1, keepdims=True)
    var = jnp.mean(jnp.square(x - mean), axis=-1, keepdims=True)
    y = (x - mean) * lax.rsqrt(var + eps) * g_ref[...] + b_ref[...]
    acc_ref[...] += jnp.sum(y, axis=1)                        # (B, D)

    @pl.when(t == pl.num_programs(0) - 1)
    def _finalize():
        pooled = acc_ref[...] * (1.0 / n_tokens)              # (B, D) f32
        # dropout(p=0.1) is identity at inference (eval mode).
        logits = jnp.dot(pooled, w_ref[...],
                         preferred_element_type=jnp.float32) + cb_ref[...]
        o_ref[...] = logits


def ln_pool_classify(h, g, b, w, cb, *, tn=256, eps=1e-6):
    """h: (B, N, D) bf16, w: (D, C) f32 -> logits (B, C) f32."""
    B, N, D = h.shape
    C = w.shape[1]
    tn = _tile(N, tn)
    grid = (N // tn,)
    return pl.pallas_call(
        functools.partial(_ln_pool_cls_kernel, eps=eps, n_tokens=N),
        out_shape=jax.ShapeDtypeStruct((B, C), jnp.float32),
        grid=grid,
        in_specs=[
            pl.BlockSpec((B, tn, D), lambda t: (0, t, 0)),
            pl.BlockSpec((1, 1, D), lambda t: (0, 0, 0)),
            pl.BlockSpec((1, 1, D), lambda t: (0, 0, 0)),
            pl.BlockSpec((D, C), lambda t: (0, 0)),
            pl.BlockSpec((1, C), lambda t: (0, 0)),
        ],
        out_specs=pl.BlockSpec((B, C), lambda t: (0, 0)),
        scratch_shapes=[pltpu.VMEM((B, D), jnp.float32)],
        compiler_params=pltpu.CompilerParams(
            dimension_semantics=("arbitrary",),
            vmem_limit_bytes=_VMEM_LIMIT),
    )(h, g.reshape(1, 1, D).astype(jnp.float32),
      b.reshape(1, 1, D).astype(jnp.float32),
      w.astype(jnp.float32), cb.reshape(1, C).astype(jnp.float32))


# ---------------------------------------------------------------------------
# Deterministic parameter init (synthetic backbone, same forward structure)
#   qkv weight columns are ordered [3][heads][head_dim] (q_all | k_all | v_all,
#   each per-head contiguous).
#   TODO(synk): verify packing order against HF VideoMAE's separate q/k/v
#   projections when loading real pretrained weights.
# ---------------------------------------------------------------------------
def init_params(key, *, patch_dim, hidden, mlp_dim, layers, n_tokens,
                num_classes):
    def dense(k, fan_in, fan_out):
        kw, _ = jax.random.split(k)
        w = 0.02 * jax.random.normal(kw, (fan_in, fan_out), jnp.float32)
        b = jnp.zeros((fan_out,), jnp.float32)
        return w, b

    keys = jax.random.split(key, 4 + layers)
    params = {}
    params["embed_w"], params["embed_b"] = dense(keys[0], patch_dim, hidden)
    params["pos_emb"] = 0.02 * jax.random.normal(
        keys[1], (1, n_tokens, hidden), jnp.float32)
    params["lnf_g"] = jnp.ones((hidden,), jnp.float32)
    params["lnf_b"] = jnp.zeros((hidden,), jnp.float32)
    params["cls_w"], params["cls_b"] = dense(keys[2], hidden, num_classes)

    blocks = []
    for li in range(layers):
        bk = jax.random.split(keys[4 + li], 4)
        blk = {
            "ln1_g": jnp.ones((hidden,), jnp.float32),
            "ln1_b": jnp.zeros((hidden,), jnp.float32),
            "ln2_g": jnp.ones((hidden,), jnp.float32),
            "ln2_b": jnp.zeros((hidden,), jnp.float32),
        }
        blk["qkv_w"], blk["qkv_b"] = dense(bk[0], hidden, 3 * hidden)
        blk["proj_w"], blk["proj_b"] = dense(bk[1], hidden, hidden)
        blk["fc1_w"], blk["fc1_b"] = dense(bk[2], hidden, mlp_dim)
        blk["fc2_w"], blk["fc2_b"] = dense(bk[3], mlp_dim, hidden)
        blocks.append(blk)
    params["blocks"] = blocks
    return params


# ---------------------------------------------------------------------------
# Forward pass (mirrors VideoMAEClassifier.forward)
# ---------------------------------------------------------------------------
def videomae_classifier_forward(params, x, *, heads, tubelet=2, patch=8):
    # x: (B, T, C, H, W) -> permute(0, 2, 1, 3, 4) -> (B, C, T, H, W), float32
    x = jnp.transpose(x, (0, 2, 1, 3, 4)).astype(jnp.float32)
    B, C, T, H, W = x.shape

    # --- tubelet / patch embedding: conv3d(kernel=stride=(tubelet,patch,patch))
    # expressed as patch extraction (glue, done in bf16 to halve HBM bytes)
    # + Pallas tiled matmul (MXU hot path).
    # TODO(synk): fold the patch gather into the embed linear's index_map so the
    # re-layout never materializes in HBM.
    x = x.astype(jnp.bfloat16)
    x = x.reshape(B, C, T // tubelet, tubelet, H // patch, patch, W // patch, patch)
    x = jnp.transpose(x, (0, 2, 4, 6, 1, 3, 5, 7))  # (B, Tt, Hp, Wp, C, kt, kp, kp)
    N = (T // tubelet) * (H // patch) * (W // patch)
    patch_dim = C * tubelet * patch * patch
    patches = x.reshape(B * N, patch_dim)

    D = params["embed_w"].shape[1]
    Dh = D // heads

    # pos-embedding streamed as an (N, D) residual (no (B*N, D) broadcast in HBM).
    pos = _bf16(params["pos_emb"].reshape(N, D))
    h = linear(patches, _bf16(params["embed_w"]), params["embed_b"],
               residual=pos)                                     # (B*N, D) bf16

    for blk in params["blocks"]:
        # --- self-attention sub-block (ln1 fused into qkv matmul)
        qkv = ln_linear(h, blk["ln1_g"], blk["ln1_b"],
                        _bf16(blk["qkv_w"]), blk["qkv_b"])       # (B*N, 3D)
        # split into per-head q/k/v planes for the flash kernel.
        # TODO(synk): fuse this head re-layout into the attention / proj
        # index_maps to avoid the HBM transpose.
        qkv5 = jnp.transpose(qkv.reshape(B, N, 3, heads, Dh), (2, 0, 3, 1, 4))
        q = qkv5[0].reshape(B * heads, N, Dh)
        k = qkv5[1].reshape(B * heads, N, Dh)
        v = qkv5[2].reshape(B * heads, N, Dh)
        a = attention(q, k, v)                                   # (B*heads, N, Dh)
        a = jnp.transpose(a.reshape(B, heads, N, Dh),
                          (0, 2, 1, 3)).reshape(B * N, D)
        # TODO(synk): optionally fuse the proj matmul into the attention
        # epilogue to save one HBM round trip per layer.
        h = linear(a, _bf16(blk["proj_w"]), blk["proj_b"],
                   residual=h)                                   # fused residual

        # --- MLP sub-block (ln2 fused into fc1, residual fused into fc2)
        y = ln_linear(h, blk["ln2_g"], blk["ln2_b"],
                      _bf16(blk["fc1_w"]), blk["fc1_b"], activation="gelu")
        h = linear(y, _bf16(blk["fc2_w"]), blk["fc2_b"], residual=h)

    # --- final norm + token mean-pool + dropout(identity) + classifier, fused.
    # pooled stays f32 into the classifier matmul for clean logits.
    logits = ln_pool_classify(h.reshape(B, N, D), params["lnf_g"],
                              params["lnf_b"], params["cls_w"],
                              params["cls_b"])
    return logits


# ---------------------------------------------------------------------------
if __name__ == "__main__":
    key = jax.random.PRNGKey(0)
    k_param, k_data = jax.random.split(key)

    # Small shapes consistent with the module's forward:
    # x is (B, frames, channels, H, W); the module permutes to (B, C, T, H, W).
    B, T, C, H, W = 2, 8, 3, 16, 16
    TUBELET, PATCH = 2, 8
    HIDDEN, HEADS, MLP, LAYERS, NUM_CLASSES = 32, 4, 64, 2, 2
    N_TOKENS = (T // TUBELET) * (H // PATCH) * (W // PATCH)
    PATCH_DIM = C * TUBELET * PATCH * PATCH

    params = init_params(
        k_param,
        patch_dim=PATCH_DIM,
        hidden=HIDDEN,
        mlp_dim=MLP,
        layers=LAYERS,
        n_tokens=N_TOKENS,
        num_classes=NUM_CLASSES,
    )

    x = jax.random.normal(k_data, (B, T, C, H, W), dtype=jnp.float32)

    forward = jax.jit(functools.partial(
        videomae_classifier_forward, heads=HEADS, tubelet=TUBELET, patch=PATCH))
    logits = forward(params, x)
    logits = jax.block_until_ready(logits)
    assert logits.shape == (B, NUM_CLASSES)
    assert bool(jnp.all(jnp.isfinite(logits)))
    print("KERNEL_OK")
</pallas_src>

<mosaic_0001>
module attributes {stable_mosaic.version = 11 : i64} {
  func.func @_tiled_linear_kernel(%arg0: i32, %arg1: i32, %arg2: i32, %arg3: memref<16x384xbf16, #tpu.memory_space<vmem>>, %arg4: memref<384x32xbf16, #tpu.memory_space<vmem>>, %arg5: memref<1x32xf32, #tpu.memory_space<vmem>>, %arg6: memref<16x32xbf16, #tpu.memory_space<vmem>>, %arg7: memref<16x32xbf16, #tpu.memory_space<vmem>>, %arg8: memref<16x32xf32, #tpu.memory_space<vmem>>) attributes {dimension_semantics = [#tpu.dimension_semantics<parallel>, #tpu.dimension_semantics<parallel>, #tpu.dimension_semantics<arbitrary>], iteration_bounds = array<i64: 2, 1, 1>, scalar_prefetch = 0 : i64, scratch_operands = 1 : i64, tpu.core_type = #tpu.core_type<tc>, window_params = [{transform_indices = @transform_0, window_bounds = array<i64: 16, 384>}, {transform_indices = @transform_1, window_bounds = array<i64: 384, 32>}, {transform_indices = @transform_2, window_bounds = array<i64: 1, 32>}, {transform_indices = @transform_3, window_bounds = array<i64: 16, 32>}, {transform_indices = @transform_4, window_bounds = array<i64: 16, 32>}]} {
    %c0_i32 = arith.constant 0 : i32
    %0 = arith.cmpi eq, %arg2, %c0_i32 : i32
    %1 = arith.extui %0 : i1 to i32
    %c0_i32_0 = arith.constant 0 : i32
    %2 = arith.cmpi ne, %1, %c0_i32_0 : i32
    scf.if %2 {
      %cst_10 = arith.constant 0.000000e+00 : f32
      %12 = vector.broadcast %cst_10 : f32 to vector<16x32xf32>
      %c0_11 = arith.constant 0 : index
      %c0_12 = arith.constant 0 : index
      %13 = vector.load %arg8[%c0_11, %c0_12] : memref<16x32xf32, #tpu.memory_space<vmem>>, vector<16x32xf32>
      tpu.vector_store %arg8[%c0_11, %c0_12], %12 {strides = array<i32>} : memref<16x32xf32, #tpu.memory_space<vmem>>, vector<16x32xf32>,
    } else {
    }
    %c0 = arith.constant 0 : index
    %c0_1 = arith.constant 0 : index
    %3 = vector.load %arg8[%c0, %c0_1] : memref<16x32xf32, #tpu.memory_space<vmem>>, vector<16x32xf32>
    %c0_2 = arith.constant 0 : index
    %c0_3 = arith.constant 0 : index
    %4 = vector.load %arg3[%c0_2, %c0_3] : memref<16x384xbf16, #tpu.memory_space<vmem>>, vector<16x384xbf16>
    %c0_4 = arith.constant 0 : index
    %c0_5 = arith.constant 0 : index
    %5 = vector.load %arg4[%c0_4, %c0_5] : memref<384x32xbf16, #tpu.memory_space<vmem>>, vector<384x32xbf16>
    %cst = arith.constant dense<0.000000e+00> : vector<16x32xf32>
    %6 = tpu.matmul %4, %5, %cst {dimension_numbers = #tpu.dot_dimension_numbers<[1], [0], [0], [1], [0, 0, 1, 1], [], []>} : vector<16x384xbf16>, vector<384x32xbf16>, vector<16x32xf32> -> vector<16x32xf32>
    %7 = arith.addf %3, %6 : vector<16x32xf32>
    %c0_6 = arith.constant 0 : index
    %c0_7 = arith.constant 0 : index
    %8 = vector.load %arg8[%c0_6, %c0_7] : memref<16x32xf32, #tpu.memory_space<vmem>>, vector<16x32xf32>
    tpu.vector_store %arg8[%c0_6, %c0_7], %7 {strides = array<i32>} : memref<16x32xf32, #tpu.memory_space<vmem>>, vector<16x32xf32>,
    %c0_i32_8 = arith.constant 0 : i32
    %9 = arith.cmpi eq, %arg2, %c0_i32_8 : i32
    %10 = arith.extui %9 : i1 to i32
    %c0_i32_9 = arith.constant 0 : i32
    %11 = arith.cmpi ne, %10, %c0_i32_9 : i32
    scf.if %11 {
      %c0_10 = arith.constant 0 : index
      %c0_11 = arith.constant 0 : index
      %12 = vector.load %arg8[%c0_10, %c0_11] : memref<16x32xf32, #tpu.memory_space<vmem>>, vector<16x32xf32>
      %c0_12 = arith.constant 0 : index
      %c0_13 = arith.constant 0 : index
      %13 = vector.load %arg5[%c0_12, %c0_13] : memref<1x32xf32, #tpu.memory_space<vmem>>, vector<1x32xf32>
      %14 = vector.broadcast %13 : vector<1x32xf32> to vector<16x32xf32>
      %15 = arith.addf %12, %14 : vector<16x32xf32>
      %c0_14 = arith.constant 0 : index
      %c0_15 = arith.constant 0 : index
      %16 = vector.load %arg6[%c0_14, %c0_15] : memref<16x32xbf16, #tpu.memory_space<vmem>>, vector<16x32xbf16>
      %17 = arith.extf %16 : vector<16x32xbf16> to vector<16x32xf32>
      %18 = arith.addf %15, %17 : vector<16x32xf32>
      %19 = arith.truncf %18 : vector<16x32xf32> to vector<16x32xbf16>
      %c0_16 = arith.constant 0 : index
      %c0_17 = arith.constant 0 : index
      %20 = vector.load %arg7[%c0_16, %c0_17] : memref<16x32xbf16, #tpu.memory_space<vmem>>, vector<16x32xbf16>
      tpu.vector_store %arg7[%c0_16, %c0_17], %19 {strides = array<i32>} : memref<16x32xbf16, #tpu.memory_space<vmem>>, vector<16x32xbf16>,
    } else {
    }
    return
  }
  func.func @transform_0(%arg0: i32, %arg1: i32, %arg2: i32) -> (i32, i32) {
    %c0_i32 = arith.constant 0 : i32
    return %arg0, %arg2 : i32, i32
  }
  func.func @transform_1(%arg0: i32, %arg1: i32, %arg2: i32) -> (i32, i32) {
    %c0_i32 = arith.constant 0 : i32
    return %arg2, %arg1 : i32, i32
  }
  func.func @transform_2(%arg0: i32, %arg1: i32, %arg2: i32) -> (i32, i32) {
    %c0_i32 = arith.constant 0 : i32
    %c0_i32_0 = arith.constant 0 : i32
    return %c0_i32, %arg1 : i32, i32
  }
  func.func @transform_3(%arg0: i32, %arg1: i32, %arg2: i32) -> (i32, i32) {
    %c1_i32 = arith.constant 1 : i32
    %c0_i32 = arith.constant 0 : i32
    %0 = arith.cmpi eq, %c1_i32, %c0_i32 : i32
    %c1_i32_0 = arith.constant 1 : i32
    %1 = arith.select %0, %c1_i32_0, %c1_i32 : i32
    %2 = arith.remsi %arg0, %1 : i32
    %c0_i32_1 = arith.constant 0 : i32
    %3 = arith.cmpi ne, %2, %c0_i32_1 : i32
    %c0_i32_2 = arith.constant 0 : i32
    %4 = arith.cmpi slt, %2, %c0_i32_2 : i32
    %c0_i32_3 = arith.constant 0 : i32
    %5 = arith.cmpi slt, %1, %c0_i32_3 : i32
    %6 = arith.xori %4, %5 : i1
    %7 = arith.andi %6, %3 : i1
    %8 = arith.addi %2, %1 : i32
    %9 = arith.select %7, %8, %2 : i32
    %c0_i32_4 = arith.constant 0 : i32
    return %9, %arg1 : i32, i32
  }
  func.func @transform_4(%arg0: i32, %arg1: i32, %arg2: i32) -> (i32, i32) {
    %c0_i32 = arith.constant 0 : i32
    return %arg0, %arg1 : i32, i32
  }
}

module attributes {stable_mosaic.version = 11 : i64} {
  func.func @_ln_linear_kernel(%arg0: i32, %arg1: i32, %arg2: memref<32x32xbf16, #tpu.memory_space<vmem>>, %arg3: memref<1x32xf32, #tpu.memory_space<vmem>>, %arg4: memref<1x32xf32, #tpu.memory_space<vmem>>, %arg5: memref<32x96xbf16, #tpu.memory_space<vmem>>, %arg6: memref<1x96xf32, #tpu.memory_space<vmem>>, %arg7: memref<32x96xbf16, #tpu.memory_space<vmem>>, %arg8: memref<32x32xbf16, #tpu.memory_space<vmem>>) attributes {dimension_semantics = [#tpu.dimension_semantics<parallel>, #tpu.dimension_semantics<arbitrary>], iteration_bounds = array<i64: 1, 1>, scalar_prefetch = 0 : i64, scratch_operands = 1 : i64, tpu.core_type = #tpu.core_type<tc>, window_params = [{transform_indices = @transform_0, window_bounds = array<i64: 32, 32>}, {pipeline_mode = #tpu.pipeline_mode<synchronous>, transform_indices = @transform_1, window_bounds = array<i64: 1, 32>}, {pipeline_mode = #tpu.pipeline_mode<synchronous>, transform_indices = @transform_2, window_bounds = array<i64: 1, 32>}, {transform_indices = @transform_3, window_bounds = array<i64: 32, 96>}, {transform_indices = @transform_4, window_bounds = array<i64: 1, 96>}, {transform_indices = @transform_5, window_bounds = array<i64: 32, 96>}]} {
    %c0_i32 = arith.constant 0 : i32
    %0 = arith.cmpi eq, %arg1, %c0_i32 : i32
    %1 = arith.extui %0 : i1 to i32
    %c0_i32_0 = arith.constant 0 : i32
    %2 = arith.cmpi ne, %1, %c0_i32_0 : i32
    scf.if %2 {
      %c0_8 = arith.constant 0 : index
      %c0_9 = arith.constant 0 : index
      %11 = vector.load %arg2[%c0_8, %c0_9] : memref<32x32xbf16, #tpu.memory_space<vmem>>, vector<32x32xbf16>
      %12 = arith.extf %11 : vector<32x32xbf16> to vector<32x32xf32>
      %cst_10 = arith.constant dense<0.000000e+00> : vector<32xf32>
      %13 = vector.multi_reduction <add>, %12, %cst_10 [1] : vector<32x32xf32> to vector<32xf32>
      %14 = vector.shape_cast %13 : vector<32xf32> to vector<32x1xf32>
      %cst_11 = arith.constant 3.200000e+01 : f32
      %15 = vector.broadcast %cst_11 : f32 to vector<32x1xf32>
      %16 = arith.divf %14, %15 : vector<32x1xf32>
      %17 = vector.broadcast %16 : vector<32x1xf32> to vector<32x32xf32>
      %18 = arith.subf %12, %17 : vector<32x32xf32>
      %19 = arith.mulf %18, %18 : vector<32x32xf32>
      %cst_12 = arith.constant dense<0.000000e+00> : vector<32xf32>
      %20 = vector.multi_reduction <add>, %19, %cst_12 [1] : vector<32x32xf32> to vector<32xf32>
      %21 = vector.shape_cast %20 : vector<32xf32> to vector<32x1xf32>
      %cst_13 = arith.constant 3.200000e+01 : f32
      %22 = vector.broadcast %cst_13 : f32 to vector<32x1xf32>
      %23 = arith.divf %21, %22 : vector<32x1xf32>
      %24 = vector.broadcast %16 : vector<32x1xf32> to vector<32x32xf32>
      %25 = arith.subf %12, %24 : vector<32x32xf32>
      %cst_14 = arith.constant 9.99999997E-7 : f32
      %26 = vector.broadcast %cst_14 : f32 to vector<32x1xf32>
      %27 = arith.addf %23, %26 : vector<32x1xf32>
      %28 = math.rsqrt %27 : vector<32x1xf32>
      %29 = vector.broadcast %28 : vector<32x1xf32> to vector<32x32xf32>
      %30 = arith.mulf %25, %29 : vector<32x32xf32>
      %c0_15 = arith.constant 0 : index
      %c0_16 = arith.constant 0 : index
      %31 = vector.load %arg3[%c0_15, %c0_16] : memref<1x32xf32, #tpu.memory_space<vmem>>, vector<1x32xf32>
      %32 = vector.broadcast %31 : vector<1x32xf32> to vector<32x32xf32>
      %33 = arith.mulf %30, %32 : vector<32x32xf32>
      %c0_17 = arith.constant 0 : index
      %c0_18 = arith.constant 0 : index
      %34 = vector.load %arg4[%c0_17, %c0_18] : memref<1x32xf32, #tpu.memory_space<vmem>>, vector<1x32xf32>
      %35 = vector.broadcast %34 : vector<1x32xf32> to vector<32x32xf32>
      %36 = arith.addf %33, %35 : vector<32x32xf32>
      %37 = arith.truncf %36 : vector<32x32xf32> to vector<32x32xbf16>
      %c0_19 = arith.constant 0 : index
      %c0_20 = arith.constant 0 : index
      %38 = vector.load %arg8[%c0_19, %c0_20] : memref<32x32xbf16, #tpu.memory_space<vmem>>, vector<32x32xbf16>
      tpu.vector_store %arg8[%c0_19, %c0_20], %37 {strides = array<i32>} : memref<32x32xbf16, #tpu.memory_space<vmem>>, vector<32x32xbf16>,
    } else {
    }
    %c0 = arith.constant 0 : index
    %c0_1 = arith.constant 0 : index
    %3 = vector.load %arg8[%c0, %c0_1] : memref<32x32xbf16, #tpu.memory_space<vmem>>, vector<32x32xbf16>
    %c0_2 = arith.constant 0 : index
    %c0_3 = arith.constant 0 : index
    %4 = vector.load %arg5[%c0_2, %c0_3] : memref<32x96xbf16, #tpu.memory_space<vmem>>, vector<32x96xbf16>
    %cst = arith.constant dense<0.000000e+00> : vector<32x96xf32>
    %5 = tpu.matmul %3, %4, %cst {dimension_numbers = #tpu.dot_dimension_numbers<[1], [0], [0], [1], [0, 0, 1, 1], [], []>} : vector<32x32xbf16>, vector<32x96xbf16>, vector<32x96xf32> -> vector<32x96xf32>
    %c0_4 = arith.constant 0 : index
    %c0_5 = arith.constant 0 : index
    %6 = vector.load %arg6[%c0_4, %c0_5] : memref<1x96xf32, #tpu.memory_space<vmem>>, vector<1x96xf32>
    %7 = vector.broadcast %6 : vector<1x96xf32> to vector<32x96xf32>
    %8 = arith.addf %5, %7 : vector<32x96xf32>
    %9 = arith.truncf %8 : vector<32x96xf32> to vector<32x96xbf16>
    %c0_6 = arith.constant 0 : index
    %c0_7 = arith.constant 0 : index
    %10 = vector.load %arg7[%c0_6, %c0_7] : memref<32x96xbf16, #tpu.memory_space<vmem>>, vector<32x96xbf16>
    tpu.vector_store %arg7[%c0_6, %c0_7], %9 {strides = array<i32>} : memref<32x96xbf16, #tpu.memory_space<vmem>>, vector<32x96xbf16>,
    return
  }
  func.func @transform_0(%arg0: i32, %arg1: i32) -> (i32, i32) {
    %c0_i32 = arith.constant 0 : i32
    %c0_i32_0 = arith.constant 0 : i32
    return %arg0, %c0_i32 : i32, i32
  }
  func.func @transform_1(%arg0: i32, %arg1: i32) -> (i32, i32) {
    %c0_i32 = arith.constant 0 : i32
    %c0_i32_0 = arith.constant 0 : i32
    %c0_i32_1 = arith.constant 0 : i32
    return %c0_i32, %c0_i32_0 : i32, i32
  }
  func.func @transform_2(%arg0: i32, %arg1: i32) -> (i32, i32) {
    %c0_i32 = arith.constant 0 : i32
    %c0_i32_0 = arith.constant 0 : i32
    %c0_i32_1 = arith.constant 0 : i32
    return %c0_i32, %c0_i32_0 : i32, i32
  }
  func.func @transform_3(%arg0: i32, %arg1: i32) -> (i32, i32) {
    %c0_i32 = arith.constant 0 : i32
    %c0_i32_0 = arith.constant 0 : i32
    return %c0_i32, %arg1 : i32, i32
  }
  func.func @transform_4(%arg0: i32, %arg1: i32) -> (i32, i32) {
    %c0_i32 = arith.constant 0 : i32
    %c0_i32_0 = arith.constant 0 : i32
    return %c0_i32, %arg1 : i32, i32
  }
  func.func @transform_5(%arg0: i32, %arg1: i32) -> (i32, i32) {
    %c0_i32 = arith.constant 0 : i32
    return %arg0, %arg1 : i32, i32
  }
}

module attributes {stable_mosaic.version = 11 : i64} {
  func.func @_flash_attn_kernel(%arg0: i32, %arg1: i32, %arg2: i32, %arg3: memref<1x16x8xbf16, #tpu.memory_space<vmem>>, %arg4: memref<1x16x8xbf16, #tpu.memory_space<vmem>>, %arg5: memref<1x16x8xbf16, #tpu.memory_space<vmem>>, %arg6: memref<1x16x8xbf16, #tpu.memory_space<vmem>>, %arg7: memref<16x1xf32, #tpu.memory_space<vmem>>, %arg8: memref<16x1xf32, #tpu.memory_space<vmem>>, %arg9: memref<16x8xf32, #tpu.memory_space<vmem>>) attributes {dimension_semantics = [#tpu.dimension_semantics<parallel>, #tpu.dimension_semantics<parallel>, #tpu.dimension_semantics<arbitrary>], iteration_bounds = array<i64: 8, 1, 1>, scalar_prefetch = 0 : i64, scratch_operands = 3 : i64, tpu.core_type = #tpu.core_type<tc>, window_params = [{transform_indices = @transform_0, window_bounds = array<i64: 1, 16, 8>}, {transform_indices = @transform_1, window_bounds = array<i64: 1, 16, 8>}, {transform_indices = @transform_2, window_bounds = array<i64: 1, 16, 8>}, {transform_indices = @transform_3, window_bounds = array<i64: 1, 16, 8>}]} {
    %c0_i32 = arith.constant 0 : i32
    %0 = arith.cmpi eq, %arg2, %c0_i32 : i32
    %1 = arith.extui %0 : i1 to i32
    %c0_i32_0 = arith.constant 0 : i32
    %2 = arith.cmpi ne, %1, %c0_i32_0 : i32
    scf.if %2 {
      %cst_27 = arith.constant 0xFF800000 : f32
      %38 = vector.broadcast %cst_27 : f32 to vector<16x1xf32>
      %c0_28 = arith.constant 0 : index
      %c0_29 = arith.constant 0 : index
      %39 = vector.load %arg7[%c0_28, %c0_29] : memref<16x1xf32, #tpu.memory_space<vmem>>, vector<16x1xf32>
      tpu.vector_store %arg7[%c0_28, %c0_29], %38 {strides = array<i32>} : memref<16x1xf32, #tpu.memory_space<vmem>>, vector<16x1xf32>,
      %cst_30 = arith.constant 0.000000e+00 : f32
      %40 = vector.broadcast %cst_30 : f32 to vector<16x1xf32>
      %c0_31 = arith.constant 0 : index
      %c0_32 = arith.constant 0 : index
      %41 = vector.load %arg8[%c0_31, %c0_32] : memref<16x1xf32, #tpu.memory_space<vmem>>, vector<16x1xf32>
      tpu.vector_store %arg8[%c0_31, %c0_32], %40 {strides = array<i32>} : memref<16x1xf32, #tpu.memory_space<vmem>>, vector<16x1xf32>,
      %cst_33 = arith.constant 0.000000e+00 : f32
      %42 = vector.broadcast %cst_33 : f32 to vector<16x8xf32>
      %c0_34 = arith.constant 0 : index
      %c0_35 = arith.constant 0 : index
      %43 = vector.load %arg9[%c0_34, %c0_35] : memref<16x8xf32, #tpu.memory_space<vmem>>, vector<16x8xf32>
      tpu.vector_store %arg9[%c0_34, %c0_35], %42 {strides = array<i32>} : memref<16x8xf32, #tpu.memory_space<vmem>>, vector<16x8xf32>,
    } else {
    }
    %c0 = arith.constant 0 : index
    %c0_1 = arith.constant 0 : index
    %c0_2 = arith.constant 0 : index
    %3 = vector.load %arg3[%c0, %c0_1, %c0_2] : memref<1x16x8xbf16, #tpu.memory_space<vmem>>, vector<1x16x8xbf16>
    %4 = vector.shape_cast %3 : vector<1x16x8xbf16> to vector<16x8xbf16>
    %cst = arith.constant 3.535160e-01 : bf16
    %5 = vector.broadcast %cst : bf16 to vector<16x8xbf16>
    %6 = arith.mulf %4, %5 : vector<16x8xbf16>
    %c0_3 = arith.constant 0 : index
    %c0_4 = arith.constant 0 : index
    %c0_5 = arith.constant 0 : index
    %7 = vector.load %arg4[%c0_3, %c0_4, %c0_5] : memref<1x16x8xbf16, #tpu.memory_space<vmem>>, vector<1x16x8xbf16>
    %8 = vector.shape_cast %7 : vector<1x16x8xbf16> to vector<16x8xbf16>
    %c0_6 = arith.constant 0 : index
    %c0_7 = arith.constant 0 : index
    %c0_8 = arith.constant 0 : index
    %9 = vector.load %arg5[%c0_6, %c0_7, %c0_8] : memref<1x16x8xbf16, #tpu.memory_space<vmem>>, vector<1x16x8xbf16>
    %10 = vector.shape_cast %9 : vector<1x16x8xbf16> to vector<16x8xbf16>
    %cst_9 = arith.constant dense<0.000000e+00> : vector<16x16xf32>
    %11 = tpu.matmul %6, %8, %cst_9 {dimension_numbers = #tpu.dot_dimension_numbers<[1], [1], [0], [0], [0, 0, 1, 0], [], []>} : vector<16x8xbf16>, vector<16x8xbf16>, vector<16x16xf32> -> vector<16x16xf32>
    %c0_10 = arith.constant 0 : index
    %c0_11 = arith.constant 0 : index
    %12 = vector.load %arg7[%c0_10, %c0_11] : memref<16x1xf32, #tpu.memory_space<vmem>>, vector<16x1xf32>
    %cst_12 = arith.constant dense<0xFF800000> : vector<16xf32>
    %13 = vector.multi_reduction <maximumf>, %11, %cst_12 [1] : vector<16x16xf32> to vector<16xf32>
    %14 = vector.shape_cast %13 : vector<16xf32> to vector<16x1xf32>
    %15 = arith.maximumf %12, %14 : vector<16x1xf32>
    %16 = arith.subf %12, %15 : vector<16x1xf32>
    %17 = math.exp %16 : vector<16x1xf32>
    %18 = vector.broadcast %15 : vector<16x1xf32> to vector<16x16xf32>
    %19 = arith.subf %11, %18 : vector<16x16xf32>
    %20 = math.exp %19 : vector<16x16xf32>
    %c0_13 = arith.constant 0 : index
    %c0_14 = arith.constant 0 : index
    %21 = vector.load %arg8[%c0_13, %c0_14] : memref<16x1xf32, #tpu.memory_space<vmem>>, vector<16x1xf32>
    %22 = arith.mulf %17, %21 : vector<16x1xf32>
    %cst_15 = arith.constant dense<0.000000e+00> : vector<16xf32>
    %23 = vector.multi_reduction <add>, %20, %cst_15 [1] : vector<16x16xf32> to vector<16xf32>
    %24 = vector.shape_cast %23 : vector<16xf32> to vector<16x1xf32>
    %25 = arith.addf %22, %24 : vector<16x1xf32>
    %c0_16 = arith.constant 0 : index
    %c0_17 = arith.constant 0 : index
    %26 = vector.load %arg8[%c0_16, %c0_17] : memref<16x1xf32, #tpu.memory_space<vmem>>, vector<16x1xf32>
    tpu.vector_store %arg8[%c0_16, %c0_17], %25 {strides = array<i32>} : memref<16x1xf32, #tpu.memory_space<vmem>>, vector<16x1xf32>,
    %c0_18 = arith.constant 0 : index
    %c0_19 = arith.constant 0 : index
    %27 = vector.load %arg9[%c0_18, %c0_19] : memref<16x8xf32, #tpu.memory_space<vmem>>, vector<16x8xf32>
    %28 = vector.broadcast %17 : vector<16x1xf32> to vector<16x8xf32>
    %29 = arith.mulf %28, %27 : vector<16x8xf32>
    %30 = arith.truncf %20 : vector<16x16xf32> to vector<16x16xbf16>
    %cst_20 = arith.constant dense<0.000000e+00> : vector<16x8xf32>
    %31 = tpu.matmul %30, %10, %cst_20 {dimension_numbers = #tpu.dot_dimension_numbers<[1], [0], [0], [1], [0, 0, 1, 1], [], []>} : vector<16x16xbf16>, vector<16x8xbf16>, vector<16x8xf32> -> vector<16x8xf32>
    %32 = arith.addf %29, %31 : vector<16x8xf32>
    %c0_21 = arith.constant 0 : index
    %c0_22 = arith.constant 0 : index
    %33 = vector.load %arg9[%c0_21, %c0_22] : memref<16x8xf32, #tpu.memory_space<vmem>>, vector<16x8xf32>
    tpu.vector_store %arg9[%c0_21, %c0_22], %32 {strides = array<i32>} : memref<16x8xf32, #tpu.memory_space<vmem>>, vector<16x8xf32>,
    %c0_23 = arith.constant 0 : index
    %c0_24 = arith.constant 0 : index
    %34 = vector.load %arg7[%c0_23, %c0_24] : memref<16x1xf32, #tpu.memory_space<vmem>>, vector<16x1xf32>
    tpu.vector_store %arg7[%c0_23, %c0_24], %15 {strides = array<i32>} : memref<16x1xf32, #tpu.memory_space<vmem>>, vector<16x1xf32>,
    %c0_i32_25 = arith.constant 0 : i32
    %35 = arith.cmpi eq, %arg2, %c0_i32_25 : i32
    %36 = arith.extui %35 : i1 to i32
    %c0_i32_26 = arith.constant 0 : i32
    %37 = arith.cmpi ne, %36, %c0_i32_26 : i32
    scf.if %37 {
      %c0_27 = arith.constant 0 : index
      %c0_28 = arith.constant 0 : index
      %38 = vector.load %arg8[%c0_27, %c0_28] : memref<16x1xf32, #tpu.memory_space<vmem>>, vector<16x1xf32>
      %39 = tpu.reciprocal %38 {approx = true} : vector<16x1xf32> -> vector<16x1xf32>
      %c0_29 = arith.constant 0 : index
      %c0_30 = arith.constant 0 : index
      %40 = vector.load %arg9[%c0_29, %c0_30] : memref<16x8xf32, #tpu.memory_space<vmem>>, vector<16x8xf32>
      %41 = vector.broadcast %39 : vector<16x1xf32> to vector<16x8xf32>
      %42 = arith.mulf %40, %41 : vector<16x8xf32>
      %43 = arith.truncf %42 : vector<16x8xf32> to vector<16x8xbf16>
      %c0_31 = arith.constant 0 : index
      %c0_32 = arith.constant 0 : index
      %c0_33 = arith.constant 0 : index
      %44 = vector.load %arg6[%c0_31, %c0_32, %c0_33] : memref<1x16x8xbf16, #tpu.memory_space<vmem>>, vector<1x16x8xbf16>
      %45 = vector.shape_cast %44 : vector<1x16x8xbf16> to vector<16x8xbf16>
      %46 = vector.shape_cast %43 : vector<16x8xbf16> to vector<1x16x8xbf16>
      tpu.vector_store %arg6[%c0_31, %c0_32, %c0_33], %46 {strides = array<i32>} : memref<1x16x8xbf16, #tpu.memory_space<vmem>>, vector<1x16x8xbf16>,
    } else {
    }
    return
  }
  func.func @transform_0(%arg0: i32, %arg1: i32, %arg2: i32) -> (i32, i32, i32) {
    %c0_i32 = arith.constant 0 : i32
    %c0_i32_0 = arith.constant 0 : i32
    return %arg0, %arg1, %c0_i32 : i32, i32, i32
  }
  func.func @transform_1(%arg0: i32, %arg1: i32, %arg2: i32) -> (i32, i32, i32) {
    %c0_i32 = arith.constant 0 : i32
    %c0_i32_0 = arith.constant 0 : i32
    return %arg0, %arg2, %c0_i32 : i32, i32, i32
  }
  func.func @transform_2(%arg0: i32, %arg1: i32, %arg2: i32) -> (i32, i32, i32) {
    %c0_i32 = arith.constant 0 : i32
    %c0_i32_0 = arith.constant 0 : i32
    return %arg0, %arg2, %c0_i32 : i32, i32, i32
  }
  func.func @transform_3(%arg0: i32, %arg1: i32, %arg2: i32) -> (i32, i32, i32) {
    %c0_i32 = arith.constant 0 : i32
    %c0_i32_0 = arith.constant 0 : i32
    return %arg0, %arg1, %c0_i32 : i32, i32, i32
  }
}

module attributes {stable_mosaic.version = 11 : i64} {
  func.func @_tiled_linear_kernel(%arg0: i32, %arg1: i32, %arg2: i32, %arg3: memref<32x32xbf16, #tpu.memory_space<vmem>>, %arg4: memref<32x32xbf16, #tpu.memory_space<vmem>>, %arg5: memref<1x32xf32, #tpu.memory_space<vmem>>, %arg6: memref<32x32xbf16, #tpu.memory_space<vmem>>, %arg7: memref<32x32xbf16, #tpu.memory_space<vmem>>, %arg8: memref<32x32xf32, #tpu.memory_space<vmem>>) attributes {dimension_semantics = [#tpu.dimension_semantics<parallel>, #tpu.dimension_semantics<parallel>, #tpu.dimension_semantics<arbitrary>], iteration_bounds = array<i64: 1, 1, 1>, scalar_prefetch = 0 : i64, scratch_operands = 1 : i64, tpu.core_type = #tpu.core_type<tc>, window_params = [{transform_indices = @transform_0, window_bounds = array<i64: 32, 32>}, {transform_indices = @transform_1, window_bounds = array<i64: 32, 32>}, {transform_indices = @transform_2, window_bounds = array<i64: 1, 32>}, {transform_indices = @transform_3, window_bounds = array<i64: 32, 32>}, {transform_indices = @transform_4, window_bounds = array<i64: 32, 32>}]} {
    %c0_i32 = arith.constant 0 : i32
    %0 = arith.cmpi eq, %arg2, %c0_i32 : i32
    %1 = arith.extui %0 : i1 to i32
    %c0_i32_0 = arith.constant 0 : i32
    %2 = arith.cmpi ne, %1, %c0_i32_0 : i32
    scf.if %2 {
      %cst_10 = arith.constant 0.000000e+00 : f32
      %12 = vector.broadcast %cst_10 : f32 to vector<32x32xf32>
      %c0_11 = arith.constant 0 : index
      %c0_12 = arith.constant 0 : index
      %13 = vector.load %arg8[%c0_11, %c0_12] : memref<32x32xf32, #tpu.memory_space<vmem>>, vector<32x32xf32>
      tpu.vector_store %arg8[%c0_11, %c0_12], %12 {strides = array<i32>} : memref<32x32xf32, #tpu.memory_space<vmem>>, vector<32x32xf32>,
    } else {
    }
    %c0 = arith.constant 0 : index
    %c0_1 = arith.constant 0 : index
    %3 = vector.load %arg8[%c0, %c0_1] : memref<32x32xf32, #tpu.memory_space<vmem>>, vector<32x32xf32>
    %c0_2 = arith.constant 0 : index
    %c0_3 = arith.constant 0 : index
    %4 = vector.load %arg3[%c0_2, %c0_3] : memref<32x32xbf16, #tpu.memory_space<vmem>>, vector<32x32xbf16>
    %c0_4 = arith.constant 0 : index
    %c0_5 = arith.constant 0 : index
    %5 = vector.load %arg4[%c0_4, %c0_5] : memref<32x32xbf16, #tpu.memory_space<vmem>>, vector<32x32xbf16>
    %cst = arith.constant dense<0.000000e+00> : vector<32x32xf32>
    %6 = tpu.matmul %4, %5, %cst {dimension_numbers = #tpu.dot_dimension_numbers<[1], [0], [0], [1], [0, 0, 1, 1], [], []>} : vector<32x32xbf16>, vector<32x32xbf16>, vector<32x32xf32> -> vector<32x32xf32>
    %7 = arith.addf %3, %6 : vector<32x32xf32>
    %c0_6 = arith.constant 0 : index
    %c0_7 = arith.constant 0 : index
    %8 = vector.load %arg8[%c0_6, %c0_7] : memref<32x32xf32, #tpu.memory_space<vmem>>, vector<32x32xf32>
    tpu.vector_store %arg8[%c0_6, %c0_7], %7 {strides = array<i32>} : memref<32x32xf32, #tpu.memory_space<vmem>>, vector<32x32xf32>,
    %c0_i32_8 = arith.constant 0 : i32
    %9 = arith.cmpi eq, %arg2, %c0_i32_8 : i32
    %10 = arith.extui %9 : i1 to i32
    %c0_i32_9 = arith.constant 0 : i32
    %11 = arith.cmpi ne, %10, %c0_i32_9 : i32
    scf.if %11 {
      %c0_10 = arith.constant 0 : index
      %c0_11 = arith.constant 0 : index
      %12 = vector.load %arg8[%c0_10, %c0_11] : memref<32x32xf32, #tpu.memory_space<vmem>>, vector<32x32xf32>
      %c0_12 = arith.constant 0 : index
      %c0_13 = arith.constant 0 : index
      %13 = vector.load %arg5[%c0_12, %c0_13] : memref<1x32xf32, #tpu.memory_space<vmem>>, vector<1x32xf32>
      %14 = vector.broadcast %13 : vector<1x32xf32> to vector<32x32xf32>
      %15 = arith.addf %12, %14 : vector<32x32xf32>
      %c0_14 = arith.constant 0 : index
      %c0_15 = arith.constant 0 : index
      %16 = vector.load %arg6[%c0_14, %c0_15] : memref<32x32xbf16, #tpu.memory_space<vmem>>, vector<32x32xbf16>
      %17 = arith.extf %16 : vector<32x32xbf16> to vector<32x32xf32>
      %18 = arith.addf %15, %17 : vector<32x32xf32>
      %19 = arith.truncf %18 : vector<32x32xf32> to vector<32x32xbf16>
      %c0_16 = arith.constant 0 : index
      %c0_17 = arith.constant 0 : index
      %20 = vector.load %arg7[%c0_16, %c0_17] : memref<32x32xbf16, #tpu.memory_space<vmem>>, vector<32x32xbf16>
      tpu.vector_store %arg7[%c0_16, %c0_17], %19 {strides = array<i32>} : memref<32x32xbf16, #tpu.memory_space<vmem>>, vector<32x32xbf16>,
    } else {
    }
    return
  }
  func.func @transform_0(%arg0: i32, %arg1: i32, %arg2: i32) -> (i32, i32) {
    %c0_i32 = arith.constant 0 : i32
    return %arg0, %arg2 : i32, i32
  }
  func.func @transform_1(%arg0: i32, %arg1: i32, %arg2: i32) -> (i32, i32) {
    %c0_i32 = arith.constant 0 : i32
    return %arg2, %arg1 : i32, i32
  }
  func.func @transform_2(%arg0: i32, %arg1: i32, %arg2: i32) -> (i32, i32) {
    %c0_i32 = arith.constant 0 : i32
    %c0_i32_0 = arith.constant 0 : i32
    return %c0_i32, %arg1 : i32, i32
  }
  func.func @transform_3(%arg0: i32, %arg1: i32, %arg2: i32) -> (i32, i32) {
    %c1_i32 = arith.constant 1 : i32
    %c0_i32 = arith.constant 0 : i32
    %0 = arith.cmpi eq, %c1_i32, %c0_i32 : i32
    %c1_i32_0 = arith.constant 1 : i32
    %1 = arith.select %0, %c1_i32_0, %c1_i32 : i32
    %2 = arith.remsi %arg0, %1 : i32
    %c0_i32_1 = arith.constant 0 : i32
    %3 = arith.cmpi ne, %2, %c0_i32_1 : i32
    %c0_i32_2 = arith.constant 0 : i32
    %4 = arith.cmpi slt, %2, %c0_i32_2 : i32
    %c0_i32_3 = arith.constant 0 : i32
    %5 = arith.cmpi slt, %1, %c0_i32_3 : i32
    %6 = arith.xori %4, %5 : i1
    %7 = arith.andi %6, %3 : i1
    %8 = arith.addi %2, %1 : i32
    %9 = arith.select %7, %8, %2 : i32
    %c0_i32_4 = arith.constant 0 : i32
    return %9, %arg1 : i32, i32
  }
  func.func @transform_4(%arg0: i32, %arg1: i32, %arg2: i32) -> (i32, i32) {
    %c0_i32 = arith.constant 0 : i32
    return %arg0, %arg1 : i32, i32
  }
}

module attributes {stable_mosaic.version = 11 : i64} {
  func.func @_ln_linear_kernel(%arg0: i32, %arg1: i32, %arg2: memref<32x32xbf16, #tpu.memory_space<vmem>>, %arg3: memref<1x32xf32, #tpu.memory_space<vmem>>, %arg4: memref<1x32xf32, #tpu.memory_space<vmem>>, %arg5: memref<32x64xbf16, #tpu.memory_space<vmem>>, %arg6: memref<1x64xf32, #tpu.memory_space<vmem>>, %arg7: memref<32x64xbf16, #tpu.memory_space<vmem>>, %arg8: memref<32x32xbf16, #tpu.memory_space<vmem>>) attributes {dimension_semantics = [#tpu.dimension_semantics<parallel>, #tpu.dimension_semantics<arbitrary>], iteration_bounds = array<i64: 1, 1>, scalar_prefetch = 0 : i64, scratch_operands = 1 : i64, tpu.core_type = #tpu.core_type<tc>, window_params = [{transform_indices = @transform_0, window_bounds = array<i64: 32, 32>}, {pipeline_mode = #tpu.pipeline_mode<synchronous>, transform_indices = @transform_1, window_bounds = array<i64: 1, 32>}, {pipeline_mode = #tpu.pipeline_mode<synchronous>, transform_indices = @transform_2, window_bounds = array<i64: 1, 32>}, {transform_indices = @transform_3, window_bounds = array<i64: 32, 64>}, {transform_indices = @transform_4, window_bounds = array<i64: 1, 64>}, {transform_indices = @transform_5, window_bounds = array<i64: 32, 64>}]} {
    %c0_i32 = arith.constant 0 : i32
    %0 = arith.cmpi eq, %arg1, %c0_i32 : i32
    %1 = arith.extui %0 : i1 to i32
    %c0_i32_0 = arith.constant 0 : i32
    %2 = arith.cmpi ne, %1, %c0_i32_0 : i32
    scf.if %2 {
      %c0_12 = arith.constant 0 : index
      %c0_13 = arith.constant 0 : index
      %24 = vector.load %arg2[%c0_12, %c0_13] : memref<32x32xbf16, #tpu.memory_space<vmem>>, vector<32x32xbf16>
      %25 = arith.extf %24 : vector<32x32xbf16> to vector<32x32xf32>
      %cst_14 = arith.constant dense<0.000000e+00> : vector<32xf32>
      %26 = vector.multi_reduction <add>, %25, %cst_14 [1] : vector<32x32xf32> to vector<32xf32>
      %27 = vector.shape_cast %26 : vector<32xf32> to vector<32x1xf32>
      %cst_15 = arith.constant 3.200000e+01 : f32
      %28 = vector.broadcast %cst_15 : f32 to vector<32x1xf32>
      %29 = arith.divf %27, %28 : vector<32x1xf32>
      %30 = vector.broadcast %29 : vector<32x1xf32> to vector<32x32xf32>
      %31 = arith.subf %25, %30 : vector<32x32xf32>
      %32 = arith.mulf %31, %31 : vector<32x32xf32>
      %cst_16 = arith.constant dense<0.000000e+00> : vector<32xf32>
      %33 = vector.multi_reduction <add>, %32, %cst_16 [1] : vector<32x32xf32> to vector<32xf32>
      %34 = vector.shape_cast %33 : vector<32xf32> to vector<32x1xf32>
      %cst_17 = arith.constant 3.200000e+01 : f32
      %35 = vector.broadcast %cst_17 : f32 to vector<32x1xf32>
      %36 = arith.divf %34, %35 : vector<32x1xf32>
      %37 = vector.broadcast %29 : vector<32x1xf32> to vector<32x32xf32>
      %38 = arith.subf %25, %37 : vector<32x32xf32>
      %cst_18 = arith.constant 9.99999997E-7 : f32
      %39 = vector.broadcast %cst_18 : f32 to vector<32x1xf32>
      %40 = arith.addf %36, %39 : vector<32x1xf32>
      %41 = math.rsqrt %40 : vector<32x1xf32>
      %42 = vector.broadcast %41 : vector<32x1xf32> to vector<32x32xf32>
      %43 = arith.mulf %38, %42 : vector<32x32xf32>
      %c0_19 = arith.constant 0 : index
      %c0_20 = arith.constant 0 : index
      %44 = vector.load %arg3[%c0_19, %c0_20] : memref<1x32xf32, #tpu.memory_space<vmem>>, vector<1x32xf32>
      %45 = vector.broadcast %44 : vector<1x32xf32> to vector<32x32xf32>
      %46 = arith.mulf %43, %45 : vector<32x32xf32>
      %c0_21 = arith.constant 0 : index
      %c0_22 = arith.constant 0 : index
      %47 = vector.load %arg4[%c0_21, %c0_22] : memref<1x32xf32, #tpu.memory_space<vmem>>, vector<1x32xf32>
      %48 = vector.broadcast %47 : vector<1x32xf32> to vector<32x32xf32>
      %49 = arith.addf %46, %48 : vector<32x32xf32>
      %50 = arith.truncf %49 : vector<32x32xf32> to vector<32x32xbf16>
      %c0_23 = arith.constant 0 : index
      %c0_24 = arith.constant 0 : index
      %51 = vector.load %arg8[%c0_23, %c0_24] : memref<32x32xbf16, #tpu.memory_space<vmem>>, vector<32x32xbf16>
      tpu.vector_store %arg8[%c0_23, %c0_24], %50 {strides = array<i32>} : memref<32x32xbf16, #tpu.memory_space<vmem>>, vector<32x32xbf16>,
    } else {
    }
    %c0 = arith.constant 0 : index
    %c0_1 = arith.constant 0 : index
    %3 = vector.load %arg8[%c0, %c0_1] : memref<32x32xbf16, #tpu.memory_space<vmem>>, vector<32x32xbf16>
    %c0_2 = arith.constant 0 : index
    %c0_3 = arith.constant 0 : index
    %4 = vector.load %arg5[%c0_2, %c0_3] : memref<32x64xbf16, #tpu.memory_space<vmem>>, vector<32x64xbf16>
    %cst = arith.constant dense<0.000000e+00> : vector<32x64xf32>
    %5 = tpu.matmul %3, %4, %cst {dimension_numbers = #tpu.dot_dimension_numbers<[1], [0], [0], [1], [0, 0, 1, 1], [], []>} : vector<32x32xbf16>, vector<32x64xbf16>, vector<32x64xf32> -> vector<32x64xf32>
    %c0_4 = arith.constant 0 : index
    %c0_5 = arith.constant 0 : index
    %6 = vector.load %arg6[%c0_4, %c0_5] : memref<1x64xf32, #tpu.memory_space<vmem>>, vector<1x64xf32>
    %7 = vector.broadcast %6 : vector<1x64xf32> to vector<32x64xf32>
    %8 = arith.addf %5, %7 : vector<32x64xf32>
    %9 = arith.mulf %8, %8 : vector<32x64xf32>
    %10 = arith.mulf %8, %9 : vector<32x64xf32>
    %cst_6 = arith.constant 4.471500e-02 : f32
    %11 = vector.broadcast %cst_6 : f32 to vector<32x64xf32>
    %12 = arith.mulf %11, %10 : vector<32x64xf32>
    %13 = arith.addf %8, %12 : vector<32x64xf32>
    %cst_7 = arith.constant 0.797884583 : f32
    %14 = vector.broadcast %cst_7 : f32 to vector<32x64xf32>
    %15 = arith.mulf %14, %13 : vector<32x64xf32>
    %16 = math.tanh %15 : vector<32x64xf32>
    %cst_8 = arith.constant 1.000000e+00 : f32
    %17 = vector.broadcast %cst_8 : f32 to vector<32x64xf32>
    %18 = arith.addf %17, %16 : vector<32x64xf32>
    %cst_9 = arith.constant 5.000000e-01 : f32
    %19 = vector.broadcast %cst_9 : f32 to vector<32x64xf32>
    %20 = arith.mulf %19, %18 : vector<32x64xf32>
    %21 = arith.mulf %8, %20 : vector<32x64xf32>
    %22 = arith.truncf %21 : vector<32x64xf32> to vector<32x64xbf16>
    %c0_10 = arith.constant 0 : index
    %c0_11 = arith.constant 0 : index
    %23 = vector.load %arg7[%c0_10, %c0_11] : memref<32x64xbf16, #tpu.memory_space<vmem>>, vector<32x64xbf16>
    tpu.vector_store %arg7[%c0_10, %c0_11], %22 {strides = array<i32>} : memref<32x64xbf16, #tpu.memory_space<vmem>>, vector<32x64xbf16>,
    return
  }
  func.func @transform_0(%arg0: i32, %arg1: i32) -> (i32, i32) {
    %c0_i32 = arith.constant 0 : i32
    %c0_i32_0 = arith.constant 0 : i32
    return %arg0, %c0_i32 : i32, i32
  }
  func.func @transform_1(%arg0: i32, %arg1: i32) -> (i32, i32) {
    %c0_i32 = arith.constant 0 : i32
    %c0_i32_0 = arith.constant 0 : i32
    %c0_i32_1 = arith.constant 0 : i32
    return %c0_i32, %c0_i32_0 : i32, i32
  }
  func.func @transform_2(%arg0: i32, %arg1: i32) -> (i32, i32) {
    %c0_i32 = arith.constant 0 : i32
    %c0_i32_0 = arith.constant 0 : i32
    %c0_i32_1 = arith.constant 0 : i32
    return %c0_i32, %c0_i32_0 : i32, i32
  }
  func.func @transform_3(%arg0: i32, %arg1: i32) -> (i32, i32) {
    %c0_i32 = arith.constant 0 : i32
    %c0_i32_0 = arith.constant 0 : i32
    return %c0_i32, %arg1 : i32, i32
  }
  func.func @transform_4(%arg0: i32, %arg1: i32) -> (i32, i32) {
    %c0_i32 = arith.constant 0 : i32
    %c0_i32_0 = arith.constant 0 : i32
    return %c0_i32, %arg1 : i32, i32
  }
  func.func @transform_5(%arg0: i32, %arg1: i32) -> (i32, i32) {
    %c0_i32 = arith.constant 0 : i32
    return %arg0, %arg1 : i32, i32
  }
}

module attributes {stable_mosaic.version = 11 : i64} {
  func.func @_ln_pool_cls_kernel(%arg0: i32, %arg1: memref<2x16x32xbf16, #tpu.memory_space<vmem>>, %arg2: memref<1x1x32xf32, #tpu.memory_space<vmem>>, %arg3: memref<1x1x32xf32, #tpu.memory_space<vmem>>, %arg4: memref<32x2xf32, #tpu.memory_space<vmem>>, %arg5: memref<1x2xf32, #tpu.memory_space<vmem>>, %arg6: memref<2x2xf32, #tpu.memory_space<vmem>>, %arg7: memref<2x32xf32, #tpu.memory_space<vmem>>) attributes {dimension_semantics = [#tpu.dimension_semantics<arbitrary>], iteration_bounds = array<i64: 1>, scalar_prefetch = 0 : i64, scratch_operands = 1 : i64, tpu.core_type = #tpu.core_type<tc>, window_params = [{transform_indices = @transform_0, window_bounds = array<i64: 2, 16, 32>}, {pipeline_mode = #tpu.pipeline_mode<synchronous>, transform_indices = @transform_1, window_bounds = array<i64: 1, 1, 32>}, {pipeline_mode = #tpu.pipeline_mode<synchronous>, transform_indices = @transform_2, window_bounds = array<i64: 1, 1, 32>}, {pipeline_mode = #tpu.pipeline_mode<synchronous>, transform_indices = @transform_3, window_bounds = array<i64: 32, 2>}, {pipeline_mode = #tpu.pipeline_mode<synchronous>, transform_indices = @transform_4, window_bounds = array<i64: 1, 2>}, {pipeline_mode = #tpu.pipeline_mode<synchronous>, transform_indices = @transform_5, window_bounds = array<i64: 2, 2>}]} {
    %c0_i32 = arith.constant 0 : i32
    %0 = arith.cmpi eq, %arg0, %c0_i32 : i32
    %1 = arith.extui %0 : i1 to i32
    %c0_i32_0 = arith.constant 0 : i32
    %2 = arith.cmpi ne, %1, %c0_i32_0 : i32
    scf.if %2 {
      %cst_20 = arith.constant 0.000000e+00 : f32
      %36 = vector.broadcast %cst_20 : f32 to vector<2x32xf32>
      %c0_21 = arith.constant 0 : index
      %c0_22 = arith.constant 0 : index
      %37 = vector.load %arg7[%c0_21, %c0_22] : memref<2x32xf32, #tpu.memory_space<vmem>>, vector<2x32xf32>
      tpu.vector_store %arg7[%c0_21, %c0_22], %36 {strides = array<i32>} : memref<2x32xf32, #tpu.memory_space<vmem>>, vector<2x32xf32>,
    } else {
    }
    %c0 = arith.constant 0 : index
    %c0_1 = arith.constant 0 : index
    %c0_2 = arith.constant 0 : index
    %3 = vector.load %arg1[%c0, %c0_1, %c0_2] : memref<2x16x32xbf16, #tpu.memory_space<vmem>>, vector<2x16x32xbf16>
    %4 = arith.extf %3 : vector<2x16x32xbf16> to vector<2x16x32xf32>
    %cst = arith.constant dense<0.000000e+00> : vector<2x16xf32>
    %5 = vector.multi_reduction <add>, %4, %cst [2] : vector<2x16x32xf32> to vector<2x16xf32>
    %6 = vector.shape_cast %5 : vector<2x16xf32> to vector<2x16x1xf32>
    %cst_3 = arith.constant 3.200000e+01 : f32
    %7 = vector.broadcast %cst_3 : f32 to vector<2x16x1xf32>
    %8 = arith.divf %6, %7 : vector<2x16x1xf32>
    %9 = vector.broadcast %8 : vector<2x16x1xf32> to vector<2x16x32xf32>
    %10 = arith.subf %4, %9 : vector<2x16x32xf32>
    %11 = arith.mulf %10, %10 : vector<2x16x32xf32>
    %cst_4 = arith.constant dense<0.000000e+00> : vector<2x16xf32>
    %12 = vector.multi_reduction <add>, %11, %cst_4 [2] : vector<2x16x32xf32> to vector<2x16xf32>
    %13 = vector.shape_cast %12 : vector<2x16xf32> to vector<2x16x1xf32>
    %cst_5 = arith.constant 3.200000e+01 : f32
    %14 = vector.broadcast %cst_5 : f32 to vector<2x16x1xf32>
    %15 = arith.divf %13, %14 : vector<2x16x1xf32>
    %16 = vector.broadcast %8 : vector<2x16x1xf32> to vector<2x16x32xf32>
    %17 = arith.subf %4, %16 : vector<2x16x32xf32>
    %cst_6 = arith.constant 9.99999997E-7 : f32
    %18 = vector.broadcast %cst_6 : f32 to vector<2x16x1xf32>
    %19 = arith.addf %15, %18 : vector<2x16x1xf32>
    %20 = math.rsqrt %19 : vector<2x16x1xf32>
    %21 = vector.broadcast %20 : vector<2x16x1xf32> to vector<2x16x32xf32>
    %22 = arith.mulf %17, %21 : vector<2x16x32xf32>
    %c0_7 = arith.constant 0 : index
    %c0_8 = arith.constant 0 : index
    %c0_9 = arith.constant 0 : index
    %23 = vector.load %arg2[%c0_7, %c0_8, %c0_9] : memref<1x1x32xf32, #tpu.memory_space<vmem>>, vector<1x1x32xf32>
    %24 = vector.broadcast %23 : vector<1x1x32xf32> to vector<2x16x32xf32>
    %25 = arith.mulf %22, %24 : vector<2x16x32xf32>
    %c0_10 = arith.constant 0 : index
    %c0_11 = arith.constant 0 : index
    %c0_12 = arith.constant 0 : index
    %26 = vector.load %arg3[%c0_10, %c0_11, %c0_12] : memref<1x1x32xf32, #tpu.memory_space<vmem>>, vector<1x1x32xf32>
    %27 = vector.broadcast %26 : vector<1x1x32xf32> to vector<2x16x32xf32>
    %28 = arith.addf %25, %27 : vector<2x16x32xf32>
    %c0_13 = arith.constant 0 : index
    %c0_14 = arith.constant 0 : index
    %29 = vector.load %arg7[%c0_13, %c0_14] : memref<2x32xf32, #tpu.memory_space<vmem>>, vector<2x32xf32>
    %cst_15 = arith.constant dense<0.000000e+00> : vector<2x32xf32>
    %30 = vector.multi_reduction <add>, %28, %cst_15 [1] : vector<2x16x32xf32> to vector<2x32xf32>
    %31 = arith.addf %29, %30 : vector<2x32xf32>
    %c0_16 = arith.constant 0 : index
    %c0_17 = arith.constant 0 : index
    %32 = vector.load %arg7[%c0_16, %c0_17] : memref<2x32xf32, #tpu.memory_space<vmem>>, vector<2x32xf32>
    tpu.vector_store %arg7[%c0_16, %c0_17], %31 {strides = array<i32>} : memref<2x32xf32, #tpu.memory_space<vmem>>, vector<2x32xf32>,
    %c0_i32_18 = arith.constant 0 : i32
    %33 = arith.cmpi eq, %arg0, %c0_i32_18 : i32
    %34 = arith.extui %33 : i1 to i32
    %c0_i32_19 = arith.constant 0 : i32
    %35 = arith.cmpi ne, %34, %c0_i32_19 : i32
    scf.if %35 {
      %c0_20 = arith.constant 0 : index
      %c0_21 = arith.constant 0 : index
      %36 = vector.load %arg7[%c0_20, %c0_21] : memref<2x32xf32, #tpu.memory_space<vmem>>, vector<2x32xf32>
      %cst_22 = arith.constant 6.250000e-02 : f32
      %37 = vector.broadcast %cst_22 : f32 to vector<2x32xf32>
      %38 = arith.mulf %36, %37 : vector<2x32xf32>
      %c0_23 = arith.constant 0 : index
      %c0_24 = arith.constant 0 : index
      %39 = vector.load %arg4[%c0_23, %c0_24] : memref<32x2xf32, #tpu.memory_space<vmem>>, vector<32x2xf32>
      %cst_25 = arith.constant dense<0.000000e+00> : vector<2x2xf32>
      %40 = tpu.matmul %38, %39, %cst_25 {dimension_numbers = #tpu.dot_dimension_numbers<[1], [0], [0], [1], [0, 0, 1, 1], [], []>} : vector<2x32xf32>, vector<32x2xf32>, vector<2x2xf32> -> vector<2x2xf32>
      %c0_26 = arith.constant 0 : index
      %c0_27 = arith.constant 0 : index
      %41 = vector.load %arg5[%c0_26, %c0_27] : memref<1x2xf32, #tpu.memory_space<vmem>>, vector<1x2xf32>
      %42 = vector.broadcast %41 : vector<1x2xf32> to vector<2x2xf32>
      %43 = arith.addf %40, %42 : vector<2x2xf32>
      %c0_28 = arith.constant 0 : index
      %c0_29 = arith.constant 0 : index
      %44 = vector.load %arg6[%c0_28, %c0_29] : memref<2x2xf32, #tpu.memory_space<vmem>>, vector<2x2xf32>
      tpu.vector_store %arg6[%c0_28, %c0_29], %43 {strides = array<i32>} : memref<2x2xf32, #tpu.memory_space<vmem>>, vector<2x2xf32>,
    } else {
    }
    return
  }
  func.func @transform_0(%arg0: i32) -> (i32, i32, i32) {
    %c0_i32 = arith.constant 0 : i32
    %c0_i32_0 = arith.constant 0 : i32
    %c0_i32_1 = arith.constant 0 : i32
    return %c0_i32, %arg0, %c0_i32_0 : i32, i32, i32
  }
  func.func @transform_1(%arg0: i32) -> (i32, i32, i32) {
    %c0_i32 = arith.constant 0 : i32
    %c0_i32_0 = arith.constant 0 : i32
    %c0_i32_1 = arith.constant 0 : i32
    %c0_i32_2 = arith.constant 0 : i32
    return %c0_i32, %c0_i32_0, %c0_i32_1 : i32, i32, i32
  }
  func.func @transform_2(%arg0: i32) -> (i32, i32, i32) {
    %c0_i32 = arith.constant 0 : i32
    %c0_i32_0 = arith.constant 0 : i32
    %c0_i32_1 = arith.constant 0 : i32
    %c0_i32_2 = arith.constant 0 : i32
    return %c0_i32, %c0_i32_0, %c0_i32_1 : i32, i32, i32
  }
  func.func @transform_3(%arg0: i32) -> (i32, i32) {
    %c0_i32 = arith.constant 0 : i32
    %c0_i32_0 = arith.constant 0 : i32
    %c0_i32_1 = arith.constant 0 : i32
    return %c0_i32, %c0_i32_0 : i32, i32
  }
  func.func @transform_4(%arg0: i32) -> (i32, i32) {
    %c0_i32 = arith.constant 0 : i32
    %c0_i32_0 = arith.constant 0 : i32
    %c0_i32_1 = arith.constant 0 : i32
    return %c0_i32, %c0_i32_0 : i32, i32
  }
  func.func @transform_5(%arg0: i32) -> (i32, i32) {
    %c0_i32 = arith.constant 0 : i32
    %c0_i32_0 = arith.constant 0 : i32
    %c0_i32_1 = arith.constant 0 : i32
    return %c0_i32, %c0_i32_0 : i32, i32
  }
}

module attributes {stable_mosaic.version = 11 : i64} {
  func.func @_tiled_linear_kernel(%arg0: i32, %arg1: i32, %arg2: i32, %arg3: memref<32x64xbf16, #tpu.memory_space<vmem>>, %arg4: memref<64x32xbf16, #tpu.memory_space<vmem>>, %arg5: memref<1x32xf32, #tpu.memory_space<vmem>>, %arg6: memref<32x32xbf16, #tpu.memory_space<vmem>>, %arg7: memref<32x32xbf16, #tpu.memory_space<vmem>>, %arg8: memref<32x32xf32, #tpu.memory_space<vmem>>) attributes {dimension_semantics = [#tpu.dimension_semantics<parallel>, #tpu.dimension_semantics<parallel>, #tpu.dimension_semantics<arbitrary>], iteration_bounds = array<i64: 1, 1, 1>, scalar_prefetch = 0 : i64, scratch_operands = 1 : i64, tpu.core_type = #tpu.core_type<tc>, window_params = [{transform_indices = @transform_0, window_bounds = array<i64: 32, 64>}, {transform_indices = @transform_1, window_bounds = array<i64: 64, 32>}, {transform_indices = @transform_2, window_bounds = array<i64: 1, 32>}, {transform_indices = @transform_3, window_bounds = array<i64: 32, 32>}, {transform_indices = @transform_4, window_bounds = array<i64: 32, 32>}]} {
    %c0_i32 = arith.constant 0 : i32
    %0 = arith.cmpi eq, %arg2, %c0_i32 : i32
    %1 = arith.extui %0 : i1 to i32
    %c0_i32_0 = arith.constant 0 : i32
    %2 = arith.cmpi ne, %1, %c0_i32_0 : i32
    scf.if %2 {
      %cst_10 = arith.constant 0.000000e+00 : f32
      %12 = vector.broadcast %cst_10 : f32 to vector<32x32xf32>
      %c0_11 = arith.constant 0 : index
      %c0_12 = arith.constant 0 : index
      %13 = vector.load %arg8[%c0_11, %c0_12] : memref<32x32xf32, #tpu.memory_space<vmem>>, vector<32x32xf32>
      tpu.vector_store %arg8[%c0_11, %c0_12], %12 {strides = array<i32>} : memref<32x32xf32, #tpu.memory_space<vmem>>, vector<32x32xf32>,
    } else {
    }
    %c0 = arith.constant 0 : index
    %c0_1 = arith.constant 0 : index
    %3 = vector.load %arg8[%c0, %c0_1] : memref<32x32xf32, #tpu.memory_space<vmem>>, vector<32x32xf32>
    %c0_2 = arith.constant 0 : index
    %c0_3 = arith.constant 0 : index
    %4 = vector.load %arg3[%c0_2, %c0_3] : memref<32x64xbf16, #tpu.memory_space<vmem>>, vector<32x64xbf16>
    %c0_4 = arith.constant 0 : index
    %c0_5 = arith.constant 0 : index
    %5 = vector.load %arg4[%c0_4, %c0_5] : memref<64x32xbf16, #tpu.memory_space<vmem>>, vector<64x32xbf16>
    %cst = arith.constant dense<0.000000e+00> : vector<32x32xf32>
    %6 = tpu.matmul %4, %5, %cst {dimension_numbers = #tpu.dot_dimension_numbers<[1], [0], [0], [1], [0, 0, 1, 1], [], []>} : vector<32x64xbf16>, vector<64x32xbf16>, vector<32x32xf32> -> vector<32x32xf32>
    %7 = arith.addf %3, %6 : vector<32x32xf32>
    %c0_6 = arith.constant 0 : index
    %c0_7 = arith.constant 0 : index
    %8 = vector.load %arg8[%c0_6, %c0_7] : memref<32x32xf32, #tpu.memory_space<vmem>>, vector<32x32xf32>
    tpu.vector_store %arg8[%c0_6, %c0_7], %7 {strides = array<i32>} : memref<32x32xf32, #tpu.memory_space<vmem>>, vector<32x32xf32>,
    %c0_i32_8 = arith.constant 0 : i32
    %9 = arith.cmpi eq, %arg2, %c0_i32_8 : i32
    %10 = arith.extui %9 : i1 to i32
    %c0_i32_9 = arith.constant 0 : i32
    %11 = arith.cmpi ne, %10, %c0_i32_9 : i32
    scf.if %11 {
      %c0_10 = arith.constant 0 : index
      %c0_11 = arith.constant 0 : index
      %12 = vector.load %arg8[%c0_10, %c0_11] : memref<32x32xf32, #tpu.memory_space<vmem>>, vector<32x32xf32>
      %c0_12 = arith.constant 0 : index
      %c0_13 = arith.constant 0 : index
      %13 = vector.load %arg5[%c0_12, %c0_13] : memref<1x32xf32, #tpu.memory_space<vmem>>, vector<1x32xf32>
      %14 = vector.broadcast %13 : vector<1x32xf32> to vector<32x32xf32>
      %15 = arith.addf %12, %14 : vector<32x32xf32>
      %c0_14 = arith.constant 0 : index
      %c0_15 = arith.constant 0 : index
      %16 = vector.load %arg6[%c0_14, %c0_15] : memref<32x32xbf16, #tpu.memory_space<vmem>>, vector<32x32xbf16>
      %17 = arith.extf %16 : vector<32x32xbf16> to vector<32x32xf32>
      %18 = arith.addf %15, %17 : vector<32x32xf32>
      %19 = arith.truncf %18 : vector<32x32xf32> to vector<32x32xbf16>
      %c0_16 = arith.constant 0 : index
      %c0_17 = arith.constant 0 : index
      %20 = vector.load %arg7[%c0_16, %c0_17] : memref<32x32xbf16, #tpu.memory_space<vmem>>, vector<32x32xbf16>
      tpu.vector_store %arg7[%c0_16, %c0_17], %19 {strides = array<i32>} : memref<32x32xbf16, #tpu.memory_space<vmem>>, vector<32x32xbf16>,
    } else {
    }
    return
  }
  func.func @transform_0(%arg0: i32, %arg1: i32, %arg2: i32) -> (i32, i32) {
    %c0_i32 = arith.constant 0 : i32
    return %arg0, %arg2 : i32, i32
  }
  func.func @transform_1(%arg0: i32, %arg1: i32, %arg2: i32) -> (i32, i32) {
    %c0_i32 = arith.constant 0 : i32
    return %arg2, %arg1 : i32, i32
  }
  func.func @transform_2(%arg0: i32, %arg1: i32, %arg2: i32) -> (i32, i32) {
    %c0_i32 = arith.constant 0 : i32
    %c0_i32_0 = arith.constant 0 : i32
    return %c0_i32, %arg1 : i32, i32
  }
  func.func @transform_3(%arg0: i32, %arg1: i32, %arg2: i32) -> (i32, i32) {
    %c1_i32 = arith.constant 1 : i32
    %c0_i32 = arith.constant 0 : i32
    %0 = arith.cmpi eq, %c1_i32, %c0_i32 : i32
    %c1_i32_0 = arith.constant 1 : i32
    %1 = arith.select %0, %c1_i32_0, %c1_i32 : i32
    %2 = arith.remsi %arg0, %1 : i32
    %c0_i32_1 = arith.constant 0 : i32
    %3 = arith.cmpi ne, %2, %c0_i32_1 : i32
    %c0_i32_2 = arith.constant 0 : i32
    %4 = arith.cmpi slt, %2, %c0_i32_2 : i32
    %c0_i32_3 = arith.constant 0 : i32
    %5 = arith.cmpi slt, %1, %c0_i32_3 : i32
    %6 = arith.xori %4, %5 : i1
    %7 = arith.andi %6, %3 : i1
    %8 = arith.addi %2, %1 : i32
    %9 = arith.select %7, %8, %2 : i32
    %c0_i32_4 = arith.constant 0 : i32
    return %9, %arg1 : i32, i32
  }
  func.func @transform_4(%arg0: i32, %arg1: i32, %arg2: i32) -> (i32, i32) {
    %c0_i32 = arith.constant 0 : i32
    return %arg0, %arg1 : i32, i32
  }
}

</mosaic_0001>

<bundles_post_ra>
// kernel: videomae_classifier_forward.12
= control target key start
LH: loop header
LB: loop body
LE: loop exit
PB: predicated region body
PF: predicated region fallthrough
CT: control target
= control target key end

     0   :  { %s987_s15 = smov 0   ;;  %s989_s16 = smov 0   ;;  %s1120_s0 = inlined_call_operand.vmem [shape: bf16[32,384], index: 0, kind: input, shape index: {}]   ;;  %s1121_s1 = inlined_call_operand.vmem [shape: bf16[384,32], index: 1, kind: input, shape index: {}]   ;;  %s1122_s2 = inlined_call_operand.vmem [shape: f32[1,32], index: 2, kind: input, shape index: {}]   ;;  %s1123_s3 = inlined_call_operand.vmem [shape: bf16[16,32], index: 3, kind: input, shape index: {}]   ;;  %s1124_s4 = inlined_call_operand.vmem [shape: bf16[32,32], index: 4, kind: output, shape index: {}]  }
   0x1   :  { %s991_s17 = smov 0  }
   0x2 LB: > { %s33_s18 = sadd.s32 1, %s954_s16  ;;  %p787_p0 = scmp.ge.s32.totalorder %s958_s17, 1  ;;  %s958_s17 = sphi %s991_s17, %s14_s17   ;;  %s954_s16 = sphi %s989_s16, %s1126_s16   ;;  %s950_s15 = sphi %s987_s15, %s1125_s15  }
   0x3   : > { %p35_p1 = scmp.ge.s32.totalorder %s33_s18, 2  ;;  %p225_p2 = scmp.lt.s32.totalorder %s958_s17, 3 }
   0x5   : > { %s1128_s18 = smov (%p35_p1, %s33_s18), 0  ;;  %p226_p3 = pnand %p787_p0, %p225_p2 }
   0x6   : > { %v908_v0 = vld [vmem:[%s1121_s1 + $0x40] sm:$0xff] (!%p226_p3)   ;;  %v960_v1 = vmov (!%p226_p3), 0.0   ;;  %v911_v4 = vld [vmem:[%s1121_s1 + $0x48] sm:$0xff] (!%p226_p3)   ;;  %vm961_vm0 = vmmov (!%p226_p3), 0   ;;  %v914_v7 = vld [vmem:[%s1121_s1 + $0x50] sm:$0xff] (!%p226_p3)   ;;  %s788_s9 = sshll.u32 (!%p226_p3), %s950_s15, 1 }
   0x7   : > { %229 = sbr.rel (%p226_p3) target bundleno = 275 (0x113), region = 36  ;;  %861 = vmatprep.subr.bf16.mxu1 (!%p226_p3), %v960_v1  ;;  %v909_v2 = vld [vmem:[%s1121_s1] sm:$0xff] (!%p226_p3)   ;;  %830 = vmatprep.subr.bf16.mxu0 (!%p226_p3), %v908_v0  ;;  %v912_v5 = vld [vmem:[%s1121_s1 + $0x8] sm:$0xff] (!%p226_p3)   ;;  %v915_v8 = vld [vmem:[%s1121_s1 + $0x10] sm:$0xff] (!%p226_p3)   ;;  %p276_p4 = scmp.lt.s32.totalorder (!%p226_p3), %s788_s9, 3  ;;  %vm316_vm1 = vcmask (!%p226_p3), 261120  }
   0x8   : > { %v910_v3 = vld [vmem:[%s1121_s1 + $0x80] sm:$0xff] (!%p226_p3)   ;;  %831 = vmatpush3.bf16.msra.mxu0 (!%p226_p3), %v909_v2  ;;  %877 = vmatprep.mubr.msk.bf16.mxu1 (!%p226_p3), %vm961_vm0, %v960_v1  ;;  %v913_v6 = vld [vmem:[%s1121_s1 + $0x88] sm:$0xff] (!%p226_p3)   ;;  %v916_v9 = vld [vmem:[%s1121_s1 + $0x90] sm:$0xff] (!%p226_p3)   ;;  %317 = vst.msk [vmem:[#allocation2] sm:$0xff] (!%p226_p3), %vm316_vm1, %v960_v1  ;;  %vm648_vm2 = vcmask (!%p226_p3), 257024  }
   0x9   : > { %862 = vmatpush3.bf16.msra.mxu1 (!%p226_p3), %v910_v3  ;;  %832 = vmatprep.subr.bf16.mxu0 (!%p226_p3), %v911_v4  ;;  %v917_v10 = vld [vmem:[%s1121_s1 + $0x58] sm:$0xff] (!%p226_p3)   ;;  %v920_v13 = vld [vmem:[%s1121_s1 + $0x60] sm:$0xff] (!%p226_p3)   ;;  %v923_v16 = vld [vmem:[%s1121_s1 + $0x68] sm:$0xff] (!%p226_p3)   ;;  %318 = vst.msk [vmem:[#allocation2 + $0x8] sm:$0xff] (!%p226_p3), %vm316_vm1, %v960_v1 }
   0xa   : > { %863 = vmatprep.subr.bf16.mxu1 (!%p226_p3), %v960_v1  ;;  %v918_v11 = vld [vmem:[%s1121_s1 + $0x18] sm:$0xff] (!%p226_p3)   ;;  %v921_v14 = vld [vmem:[%s1121_s1 + $0x20] sm:$0xff] (!%p226_p3)   ;;  %v924_v17 = vld [vmem:[%s1121_s1 + $0x28] sm:$0xff] (!%p226_p3)  }
   0xb   : > { %v919_v12 = vld [vmem:[%s1121_s1 + $0x98] sm:$0xff] (!%p226_p3)   ;;  %v922_v15 = vld [vmem:[%s1121_s1 + $0xa0] sm:$0xff] (!%p226_p3)   ;;  %v925_v18 = vld [vmem:[%s1121_s1 + $0xa8] sm:$0xff] (!%p226_p3)  }
   0xc   : > { %833 = vmatpush3.bf16.msra.mxu0 (!%p226_p3), %v912_v5  ;;  %v926_v19 = vld [vmem:[%s1121_s1 + $0x70] sm:$0xff] (!%p226_p3)   ;;  %v929_v22 = vld [vmem:[%s1121_s1 + $0x78] sm:$0xff] (!%p226_p3)   ;;  %v827_v44 = vld [vmem:[%s1123_s3] sm:$0xff] (!%p226_p3)  }
   0xd   : > { %864 = vmatpush3.bf16.msra.mxu1 (!%p226_p3), %v913_v6  ;;  %834 = vmatprep.subr.bf16.mxu0 (!%p226_p3), %v914_v7  ;;  %v927_v20 = vld [vmem:[%s1121_s1 + $0x30] sm:$0xff] (!%p226_p3)   ;;  %v930_v24 = vld [vmem:[%s1121_s1 + $0x38] sm:$0xff] (!%p226_p3)   ;;  %v819_v45 = vld [vmem:[%s1122_s2] ss:$0 sm:$0xff] (!%p226_p3)  ;;  %v828_v46 = vunpack.c.l.bf16 (!%p226_p3), %v827_v44  ;;  %v829_v49 = vunpack.c.h.bf16 (!%p226_p3), %v827_v44 }
   0xe   : > { %865 = vmatprep.subr.bf16.mxu1 %v960_v1  ;;  %s1130_s9 = smov (!%p276_p4, %s788_s9), 3  ;;  %v928_v21 = vld [vmem:[%s1121_s1 + $0xb0] sm:$0xff]   ;;  %v931_v25 = vld [vmem:[%s1121_s1 + $0xb8] sm:$0xff]  }
   0xf   : > { %s881_s5 = smul.u32 12, %s1130_s9  ;;  %v319_v34 = vld [vmem:[#allocation2] sm:$0xff] }
  0x10   : > { %835 = vmatpush3.bf16.msra.mxu0 %v915_v8  ;;  %v320_v40 = vld [vmem:[#allocation2 + $0x8] sm:$0xff] }
  0x11   : > { %866 = vmatpush3.bf16.msra.mxu1 %v916_v9  ;;  %836 = vmatprep.subr.bf16.mxu0 %v917_v10  ;;  %s283_s19 = scalar_lea.vmem %s1120_s0, %s881_s5  ;;  %s791_s5 = sshll.u32 %s1130_s9, 2 }
  0x12   : > { %867 = vmatprep.subr.bf16.mxu1 %v960_v1  ;;  %v934_v23 = vld [vmem:[%s283_s19 + $0x4] ss:$12 sps:$4 sm:$0xff]   ;;  %v932_v26 = vld [vmem:[%s283_s19] ss:$12 sps:$4 sm:$0xff]   ;;  %v935_v27 = vld [vmem:[%s283_s19 + $0x8] ss:$12 sps:$4 sm:$0xff]   ;;  %s309_s8 = scalar_lea.vmem %s1124_s4, %s791_s5 }
  0x13   : > { %565 = vmatprep.mubr.bf16.mxu0 %v934_v23 }
  0x14   : > { %837 = vmatpush3.bf16.msra.mxu0 %v918_v11 }
  0x15   : > { %868 = vmatpush3.bf16.msra.mxu1 %v919_v12  ;;  %838 = vmatprep.subr.bf16.mxu0 %v920_v13 }
  0x16   : > { %869 = vmatprep.subr.bf16.mxu1 %v960_v1 }
  0x18   : > { %839 = vmatpush3.bf16.msra.mxu0 %v921_v14 }
  0x19   : > { %870 = vmatpush3.bf16.msra.mxu1 %v922_v15  ;;  %840 = vmatprep.subr.bf16.mxu0 %v923_v16 }
  0x1a   : > { %871 = vmatprep.subr.bf16.mxu1 %v960_v1 }
  0x1c   : > { %841 = vmatpush3.bf16.msra.mxu0 %v924_v17 }
  0x1d   : > { %872 = vmatpush3.bf16.msra.mxu1 %v925_v18  ;;  %842 = vmatprep.subr.bf16.mxu0 %v926_v19 }
  0x1e   : > { %873 = vmatprep.subr.bf16.mxu1 %v960_v1 }
  0x20   : > { %843 = vmatpush3.bf16.msra.mxu0 %v927_v20 }
  0x21   : > { %874 = vmatpush3.bf16.msra.mxu1 %v928_v21  ;;  %844 = vmatprep.subr.bf16.mxu0 %v929_v22 }
  0x22   : > { %875 = vmatprep.subr.bf16.mxu1 %v960_v1 }
  0x24   : > { %845 = vmatpush3.bf16.msra.mxu0 %v930_v24 }
  0x25   : > { %876 = vmatpush3.bf16.msra.mxu1 %v931_v25 }
  0x27   : > { %566 = vmatmul.mubr.bf16.vlgmr.msra.gmra.mrb[0].mxu0 %v932_v26 }
  0x28   : > { %878 = vmatmul.mubr.bf16.vlgmr.msra.gmra.mrb[0].mxu1 %v935_v27 }
  0xfa   : > { %v846_v28 = vpop.f32.mrb[0].mxu0 }
  0xfb   : > { %v608_v29 = vpop.f32.mrb[0].mxu1  ;;  %v847_v30 = vpop.f32.mrb[1].mxu0 }
  0xfc   : > { %v848_v31 = vadd.f32 %v847_v30, %v846_v28  ;;  %v879_v32 = vpop.f32.mrb[1].mxu1  ;;  %v849_v33 = vpop.f32.mrb[2].mxu0 }
  0xfd   : > { %v611_v35 = vpop.f32.mrb[2].mxu1  ;;  %v850_v36 = vpop.f32.mrb[3].mxu0 }
  0xfe   : > { %v609_v37 = vadd.f32 %v848_v31, %v608_v29  ;;  %v851_v38 = vadd.f32 %v850_v36, %v849_v33  ;;  %v880_v39 = vpop.f32.mrb[3].mxu1 }
 0x100   : > { %v615_v41 = vadd.f32 %v609_v37, %v319_v34  ;;  %v612_v42 = vadd.f32 %v851_v38, %v611_v35 }
 0x102   : > { %618 = vst.msk [vmem:[#allocation2] sm:$0xff] %vm316_vm1, %v615_v41  ;;  %v616_v43 = vadd.f32 %v612_v42, %v320_v40 }
 0x104   : > { %619 = vst.msk [vmem:[#allocation2 + $0x8] sm:$0xff] %vm316_vm1, %v616_v43 }
 0x109   : > { %v623_v47 = vld [vmem:[#allocation2] sm:$0xff] }
 0x10a   : > { %v632_v48 = vadd.f32 %v819_v45, %v623_v47 }
 0x10b   : > { %v624_v50 = vld [vmem:[#allocation2 + $0x8] sm:$0xff] }
 0x10c   : > { %v638_v51 = vadd.f32 %v828_v46, %v632_v48  ;;  %v633_v52 = vadd.f32 %v819_v45, %v624_v50 }
 0x10e   : > { %v824_v53 = vpack.c.bf16 %v638_v51, %v638_v51  ;;  %v639_v54 = vadd.f32 %v829_v49, %v633_v52 }
 0x110   : > { %649 = vst.msk [vmem:[%s309_s8] sm:$0xf] %vm648_vm2, %v824_v53  ;;  %v825_v55 = vpack.c.bf16 %v639_v54, %v639_v54 }
 0x112   : > { %650 = vst.msk [vmem:[%s309_s8 + $0x4] sm:$0xf] %vm648_vm2, %v825_v55 }
 0x113 PF: > { %s14_s17 = sadd.s32 1, %s958_s17   ;;  %s1125_s15 = smov %s954_s16 }
 0x114   : > { %p11_p5 = scmp.ge.s32.totalorder %s14_s17, 4   ;;  %s1126_s16 = smov %s1128_s18 }
 0x116   :  { %13 = sbr.rel (!%p11_p5) target bundleno = 2 (0x2), region = 83 }

// kernel: videomae_classifier_forward.13
= control target key start
LH: loop header
LB: loop body
LE: loop exit
PB: predicated region body
PF: predicated region fallthrough
CT: control target
= control target key end

     0   :  { %vm33_vm0 = vcmask 261120   ;;  %vm210_vm1 = vcmask 781312   ;;  %s340_s0 = inlined_call_operand.vmem [shape: bf16[32,32], index: 0, kind: input, shape index: {}]   ;;  %s341_s3 = inlined_call_operand.vmem [shape: bf16[32,96], index: 3, kind: input, shape index: {}]   ;;  %s342_s1 = inlined_call_operand.vmem [shape: f32[1,32], index: 1, kind: input, shape index: {}]   ;;  %s343_s2 = inlined_call_operand.vmem [shape: f32[1,32], index: 2, kind: input, shape index: {}]   ;;  %s344_s4 = inlined_call_operand.vmem [shape: f32[1,96], index: 4, kind: input, shape index: {}]   ;;  %s345_s5 = inlined_call_operand.vmem [shape: bf16[32,96], index: 5, kind: output, shape index: {}]  }
   0x1   :  { %v235_v0 = vld [vmem:[%s340_s0] sm:$0xff]   ;;  %v242_v1 = vld [vmem:[%s340_s0 + $0x8] sm:$0xff]  }
   0x2   :  { %v236_v2 = vunpack.c.l.bf16 %v235_v0  ;;  %v240_v3 = vunpack.c.l.bf16 %v242_v1  ;;  %v237_v4 = vunpack.c.h.bf16 %v235_v0  ;;  %v241_v5 = vunpack.c.h.bf16 %v242_v1  ;;  %v255_v30 = vld [vmem:[%s341_s3] sm:$0xff]   ;;  %v256_v31 = vld [vmem:[%s341_s3 + $0x8] sm:$0xff]  }
   0x3   :  { %247 = vmatprep.subr.bf16.mxu0 %v255_v30  ;;  %v219_v46 = vld [vmem:[%s342_s1] ss:$0 sm:$0xff] }
   0x4   :  { %v34_v6 = vsel %vm33_vm0, %v236_v2, 0.0  ;;  %v40_v7 = vsel %vm33_vm0, %v240_v3, 0.0  ;;  %v37_v8 = vsel %vm33_vm0, %v237_v4, 0.0  ;;  %v43_v9 = vsel %vm33_vm0, %v241_v5, 0.0  ;;  %248 = vmatpush3.bf16.msra.mxu0 %v255_v30  ;;  %v220_v51 = vld [vmem:[%s343_s2] ss:$0 sm:$0xff] }
   0x5   :  { %35 = vadd.xlane.f32.xlu0 %v34_v6  ;;  %41 = vadd.xlane.f32.xlu1 %v40_v7 }
   0x6   :  { %249 = vmatprep.subr.bf16.mxu0 %v256_v31 }
   0x8   :  { %250 = vmatpush3.bf16.msra.mxu0 %v256_v31 }
   0x9   :  { %38 = vadd.xlane.f32.xlu0 %v37_v8  ;;  %44 = vadd.xlane.f32.xlu1 %v43_v9 }
  0x92   :  { %v36_v10 = vpop.xlane.xlu0 %35  ;;  %v42_v11 = vpop.xlane.xlu1 %41 }
  0x93   :  { %v47_v12 = vmul.f32 0.03125, %v36_v10  ;;  %v49_v13 = vmul.f32 0.03125, %v42_v11 }
  0x95   :  { %v51_v14 = vsub.f32 %v236_v2, %v47_v12  ;;  %v53_v15 = vsub.f32 %v240_v3, %v49_v13  ;;  %v221_v2 = vld [vmem:[%s344_s4] ss:$0 sm:$0xff] }
  0x96   :  { %v39_v16 = vpop.xlane.xlu0 %38  ;;  %v45_v17 = vpop.xlane.xlu1 %44 }
  0x97   :  { %v48_v18 = vmul.f32 0.03125, %v39_v16  ;;  %v50_v19 = vmul.f32 0.03125, %v45_v17  ;;  %v55_v20 = vmul.f32 %v51_v14, %v51_v14  ;;  %v57_v21 = vmul.f32 %v53_v15, %v53_v15 }
  0x99   :  { %v52_v22 = vsub.f32 %v237_v4, %v48_v18  ;;  %v54_v23 = vsub.f32 %v241_v5, %v50_v19  ;;  %v59_v24 = vsel %vm33_vm0, %v55_v20, 0.0  ;;  %v65_v25 = vsel %vm33_vm0, %v57_v21, 0.0 }
  0x9a   :  { %60 = vadd.xlane.f32.xlu0 %v59_v24 }
  0x9b   :  { %v56_v26 = vmul.f32 %v52_v22, %v52_v22  ;;  %v58_v27 = vmul.f32 %v54_v23, %v54_v23 }
  0x9d   :  { %v62_v28 = vsel %vm33_vm0, %v56_v26, 0.0  ;;  %v68_v29 = vsel %vm33_vm0, %v58_v27, 0.0 }
  0x9e   :  { %66 = vadd.xlane.f32.xlu0 %v65_v25  ;;  %63 = vadd.xlane.f32.xlu1 %v62_v28 }
  0xa2   :  { %69 = vadd.xlane.f32.xlu1 %v68_v29 }
 0x127   :  { %v61_v32 = vpop.xlane.xlu0 %60 }
 0x128   :  { %v71_v33 = vmul.f32 0.03125, %v61_v32 }
 0x12a   :  { %v75_v34 = vadd.f32 1e-06, %v71_v33 }
 0x12b   :  { %v64_v35 = vpop.xlane.xlu1 %63  ;;  %v67_v36 = vpop.xlane.xlu0 %66 }
 0x12c   :  { %257 = vrsqrt.f32 %v75_v34  ;;  %v72_v37 = vmul.f32 0.03125, %v64_v35  ;;  %v73_v38 = vmul.f32 0.03125, %v67_v36 }
 0x12e   :  { %v76_v39 = vadd.f32 1e-06, %v72_v37  ;;  %v77_v40 = vadd.f32 1e-06, %v73_v38 }
 0x12f   :  { %v70_v41 = vpop.xlane.xlu1 %69 }
 0x130   :  { %259 = vrsqrt.f32 %v76_v39  ;;  %v74_v42 = vmul.f32 0.03125, %v70_v41 }
 0x131   :  { %261 = vrsqrt.f32 %v77_v40 }
 0x132   :  { %v78_v43 = vadd.f32 1e-06, %v74_v42 }
 0x134   :  { %263 = vrsqrt.f32 %v78_v43 }
 0x136   :  { %v258_v44 = vpop.eup %257 }
 0x137   :  { %v83_v45 = vmul.f32 %v258_v44, %v51_v14 }
 0x139   :  { %v94_v49 = vmul.f32 %v219_v46, %v83_v45 }
 0x13a   :  { %v260_v47 = vpop.eup %259 }
 0x13b   :  { %v262_v48 = vpop.eup %261  ;;  %v84_v50 = vmul.f32 %v260_v47, %v52_v22  ;;  %v105_v55 = vadd.f32 %v220_v51, %v94_v49 }
 0x13c   :  { %v85_v52 = vmul.f32 %v262_v48, %v53_v15 }
 0x13d   :  { %v95_v53 = vmul.f32 %v219_v46, %v84_v50 }
 0x13e   :  { %v264_v54 = vpop.eup %263  ;;  %v96_v57 = vmul.f32 %v219_v46, %v85_v52 }
 0x13f   :  { %v106_v56 = vadd.f32 %v220_v51, %v95_v53  ;;  %v86_v58 = vmul.f32 %v264_v54, %v54_v23 }
 0x140   :  { %v107_v61 = vadd.f32 %v220_v51, %v96_v57 }
 0x141   :  { %v109_v59 = vpack.c.bf16 %v106_v56, %v105_v55  ;;  %v97_v60 = vmul.f32 %v219_v46, %v86_v58 }
 0x143   :  { %111 = vst.msk [vmem:[#allocation2] sm:$0xff] %vm33_vm0, %v109_v59  ;;  %v108_v62 = vadd.f32 %v220_v51, %v97_v60 }
 0x145   :  { %v110_v63 = vpack.c.bf16 %v108_v62, %v107_v61 }
 0x147   :  { %112 = vst.msk [vmem:[#allocation2 + $0x8] sm:$0xff] %vm33_vm0, %v110_v63 }
 0x14a   :  { %v113_v0 = vld [vmem:[#allocation2] sm:$0xff] }
 0x14b   :  { %251 = vmatprep.mubr.msk.bf16.mxu0 %vm33_vm0, %v113_v0 }
 0x14e   :  { %v114_v1 = vld [vmem:[#allocation2 + $0x8] sm:$0xff] }
 0x14f   :  { %252 = vmatmul.mubr.msk.bf16.vlgmr.msra.gmra.mrb[0].mxu0 %vm33_vm0, %v114_v1 }
 0x222   :  { %v253_v3 = vpop.f32.mrb[0].mxu0 }
 0x223   :  { %v188_v4 = vadd.f32 %v253_v3, %v221_v2  ;;  %v179_v5 = vpop.f32.mrb[1].mxu0 }
 0x224   :  { %v180_v6 = vadd.f32 %v221_v2, %v179_v5  ;;  %v254_v7 = vpop.f32.mrb[2].mxu0 }
 0x225   :  { %v232_v8 = vpack.c.bf16 %v188_v4, %v188_v4  ;;  %v191_v9 = vadd.f32 %v254_v7, %v221_v2  ;;  %v182_v10 = vpop.f32.mrb[3].mxu0 }
 0x226   :  { %v230_v11 = vpack.c.bf16 %v180_v6, %v180_v6  ;;  %v183_v12 = vadd.f32 %v221_v2, %v182_v10 }
 0x227   :  { %213 = vst.msk [vmem:[%s345_s5 + $0x8] sm:$0xf] %vm210_vm1, %v232_v8  ;;  %v233_v13 = vpack.c.bf16 %v191_v9, %v191_v9 }
 0x228   :  { %211 = vst.msk [vmem:[%s345_s5] sm:$0xf] %vm210_vm1, %v230_v11  ;;  %v231_v14 = vpack.c.bf16 %v183_v12, %v183_v12 }
 0x229   :  { %214 = vst.msk [vmem:[%s345_s5 + $0xc] sm:$0xf] %vm210_vm1, %v233_v13 }
 0x22a   :  { %212 = vst.msk [vmem:[%s345_s5 + $0x4] sm:$0xf] %vm210_vm1, %v231_v14 }

// kernel: videomae_classifier_forward.14
= control target key start
LH: loop header
LB: loop body
LE: loop exit
PB: predicated region body
PF: predicated region fallthrough
CT: control target
= control target key end

     0   :  { %s782_s12 = smov 0   ;;  %s784_s13 = smov 0   ;;  %s846_s0 = inlined_call_operand.vmem [shape: bf16[8,16,8], index: 0, kind: input, shape index: {}]   ;;  %s847_s1 = inlined_call_operand.vmem [shape: bf16[8,16,8], index: 1, kind: input, shape index: {}]   ;;  %s848_s2 = inlined_call_operand.vmem [shape: bf16[8,16,8], index: 2, kind: input, shape index: {}]   ;;  %s849_s3 = inlined_call_operand.vmem [shape: bf16[8,16,8], index: 3, kind: output, shape index: {}]  }
   0x1   :  { %s786_s14 = smov 0  }
   0x2 LB: > { %s32_s15 = sadd.s32 1, %s752_s13  ;;  %p650_p0 = scmp.ge.s32.totalorder %s756_s14, 1  ;;  %s756_s14 = sphi %s786_s14, %s13_s14   ;;  %s752_s13 = sphi %s784_s13, %s851_s13   ;;  %s748_s12 = sphi %s782_s12, %s850_s12  }
   0x3   : > { %p34_p1 = scmp.ge.s32.totalorder %s32_s15, 8  ;;  %p199_p2 = scmp.lt.s32.totalorder %s756_s14, 9 }
   0x5   : > { %s853_s15 = smov (%p34_p1, %s32_s15), 0  ;;  %p200_p3 = pnand %p650_p0, %p199_p2 }
   0x6   : > { %p250_p4 = scmp.lt.s32.totalorder (!%p200_p3), %s748_s12, 7  ;;  %vm300_vm0 = vcmask (!%p200_p3), 64512   ;;  %v758_v0 = vmov (!%p200_p3), 0.0   ;;  %vm759_vm1 = vmmov (!%p200_p3), 0   ;;  %vm295_vm2 = vcmask (!%p200_p3), 7168  }
   0x7   : > { %203 = sbr.rel (%p200_p3) target bundleno = 827 (0x33b), region = 32  ;;  %678 = vmatprep.subr.bf16.mxu0 (!%p200_p3), %v758_v0  ;;  %301 = vst.msk [vmem:[#allocation4] sm:$0xff] (!%p200_p3), %vm300_vm0, %v758_v0  ;;  %302 = vst.msk [vmem:[#allocation4 + $0x8] sm:$0xff] (!%p200_p3), %vm300_vm0, %v758_v0  ;;  %680 = vmatprep.mubr.msk.bf16.mxu0 (!%p200_p3), %vm759_vm1, %v758_v0  ;;  %v760_v8 = vmov (!%p200_p3), -inf   ;;  %vm371_vm3 = vcmask (!%p200_p3), 130048   ;;  %v761_v15 = vmov (!%p200_p3), 0  }
   0x8   : > { %684 = vmatprep.subr.bf16.mxu1 (!%p200_p3), %v758_v0  ;;  %686 = vmatprep.mubr.msk.bf16.mxu1 (!%p200_p3), %vm759_vm1, %v758_v0  ;;  %296 = vst.msk [vmem:[#allocation2] sm:$0xff] (!%p200_p3), %vm295_vm2, %v760_v8  ;;  %297 = vst.msk [vmem:[#allocation2 + $0x8] sm:$0xff] (!%p200_p3), %vm295_vm2, %v760_v8  ;;  %vm517_vm4 = vcmask (!%p200_p3), 60416  }
   0x9   : > { %298 = vst.msk [vmem:[#allocation3] sm:$0xff] (!%p200_p3), %vm295_vm2, %v758_v0  ;;  %299 = vst.msk [vmem:[#allocation3 + $0x8] sm:$0xff] (!%p200_p3), %vm295_vm2, %v758_v0  ;;  %718 = vset.pattern.permute.xlu1 (!%p200_p3), %v761_v15  ;;  %719 = vset.pattern.permute.xlu0 (!%p200_p3), %v761_v15 }
   0xe   : > { %s855_s12 = smov (!%p250_p4, %s748_s12), 7  ;;  %v417_v52 = vld [vmem:[#allocation4] sm:$0xff]  ;;  %v418_v54 = vld [vmem:[#allocation4 + $0x8] sm:$0xff] }
   0xf   : > { %s802_s16 = sshll.u32 %s855_s12, 3  ;;  %v369_v16 = vld [vmem:[#allocation2] sm:$0xff]  ;;  %v370_v19 = vld [vmem:[#allocation2 + $0x8] sm:$0xff] }
  0x10   : > { %s267_s19 = scalar_lea.vmem %s847_s1, %s802_s16  ;;  %s257_s22 = scalar_lea.vmem %s846_s0, %s802_s16  ;;  %v402_v40 = vld [vmem:[#allocation3] sm:$0xff]  ;;  %v403_v43 = vld [vmem:[#allocation3 + $0x8] sm:$0xff] }
  0x11   : > { %v720_v1 = vld [vmem:[%s267_s19] sm:$0xff]   ;;  %s277_s25 = scalar_lea.vmem %s848_s2, %s802_s16  ;;  %s287_s28 = scalar_lea.vmem %s849_s3, %s802_s16 }
  0x12   : > { %v303_v2 = vld [vmem:[%s257_s22] sm:$0xf]  ;;  %v304_v3 = vld [vmem:[%s257_s22 + $0x4] sm:$0xf]  ;;  %v326_v4 = vsel %vm300_vm0, %v720_v1, 0 }
  0x13   : > { %v305_v5 = vmul.bf16 1052065461, %v303_v2  ;;  %v306_v6 = vmul.bf16 1052065461, %v304_v3  ;;  %679 = vmatpush3.bf16.xpose.msra.mxu0 %v326_v4  ;;  %v721_v24 = vld [vmem:[%s277_s25] sm:$0xff]  }
  0x14   : > { %685 = vmatpush3.bf16.msra.mxu1 %v721_v24 }
  0x15   : > { %v659_v7 = vcombine.low %v305_v5, %v306_v6 }
  0x1a   : > { %681 = vmatmul.mubr.msk.bf16.vlgmr.msra.gmra.mrb[0].mxu0 %vm300_vm0, %v659_v7 }
  0xed   : > { %v362_v9 = vpop.f32.mrb[0].mxu0 }
  0xee   : > { %v682_v10 = vpop.f32.mrb[1].mxu0  ;;  %v372_v11 = vsel %vm371_vm3, %v362_v9, -inf }
  0xef   : > { %373 = vmax.xlane.f32.xlu0 %v372_v11  ;;  %v365_v12 = vpop.f32.mrb[2].mxu0 }
  0xf0   : > { %v683_v13 = vpop.f32.mrb[3].mxu0  ;;  %v375_v14 = vsel %vm371_vm3, %v365_v12, -inf }
  0xf3   : > { %376 = vmax.xlane.f32.xlu0 %v375_v14 }
 0x17c   : > { %v374_v17 = vpop.xlane.xlu0 %373 }
 0x17d   : > { %v378_v18 = vmax.f32 %v369_v16, %v374_v17 }
 0x17f   : > { %v380_v20 = vsub.f32 %v369_v16, %v378_v18  ;;  %486 = vst.msk [vmem:[#allocation2] sm:$0xff] %vm295_vm2, %v378_v18  ;;  %388 = vperm.xlu1 %718, %v378_v18  }
 0x180   : > { %v377_v21 = vpop.xlane.xlu0 %376 }
 0x181   : > { %v379_v22 = vmax.f32 %v370_v19, %v377_v21  ;;  %v382_v37 = vmul.f32 1.442695, %v380_v20 }
 0x183   : > { %v381_v23 = vsub.f32 %v370_v19, %v379_v22  ;;  %487 = vst.msk [vmem:[#allocation2 + $0x8] sm:$0xff] %vm295_vm2, %v379_v22  ;;  %393 = vperm.xlu1 %718, %v379_v22  }
 0x185   : > { %v384_v36 = vmul.f32 1.442695, %v381_v23 }
 0x1fe   : > { %v389_v25 = vpop.permute.xlu1 %388 }
 0x1ff   : > { %v396_v26 = vsub.f32 %v362_v9, %v389_v25 }
 0x201   : > { %v398_v27 = vmul.f32 1.442695, %v396_v26 }
 0x202   : > { %v394_v28 = vpop.permute.xlu1 %393 }
 0x203   : > { %722 = vpow2.f32 %v398_v27  ;;  %v397_v29 = vsub.f32 %v365_v12, %v394_v28 }
 0x205   : > { %v400_v30 = vmul.f32 1.442695, %v397_v29 }
 0x207   : > { %724 = vpow2.f32 %v400_v30 }
 0x208   : > { %726 = vpow2.f32 %v384_v36 }
 0x209   : > { %728 = vpow2.f32 %v382_v37 }
 0x20d   : > { %v723_v31 = vpop.eup %722 }
 0x20e   : > { %v406_v32 = vsel %vm371_vm3, %v723_v31, 0.0 }
 0x20f   : > { %407 = vadd.xlane.f32.xlu0 %v406_v32 }
 0x211   : > { %v725_v33 = vpop.eup %724 }
 0x212   : > { %v409_v34 = vsel %vm371_vm3, %v725_v33, 0.0  ;;  %v431_v35 = vpack.c.bf16 %v725_v33, %v723_v31  ;;  %v727_v38 = vpop.eup %726 }
 0x213   : > { %410 = vadd.xlane.f32.xlu1 %v409_v34  ;;  %v729_v39 = vpop.eup %728  ;;  %v405_v45 = vmul.f32 %v727_v38, %v403_v43 }
 0x214   : > { %687 = vmatmul.mubr.msk.bf16.vlgmr.msra.gmra.mrb[0].mxu1 %vm371_vm3, %v431_v35  ;;  %v404_v41 = vmul.f32 %v729_v39, %v402_v40 }
 0x224   : > { %426 = vperm.xlu1 %718, %v727_v38  }
 0x225   : > { %421 = vperm.xlu0 %719, %v729_v39  }
 0x29c   : > { %v408_v42 = vpop.xlane.xlu0 %407 }
 0x29d   : > { %v412_v44 = vadd.f32 %v408_v42, %v404_v41 }
 0x29f   : > { %415 = vst.msk [vmem:[#allocation3] sm:$0xff] %vm295_vm2, %v412_v44 }
 0x2a0   : > { %v411_v46 = vpop.xlane.xlu1 %410 }
 0x2a1   : > { %v413_v47 = vadd.f32 %v411_v46, %v405_v45 }
 0x2a3   : > { %416 = vst.msk [vmem:[#allocation3 + $0x8] sm:$0xff] %vm295_vm2, %v413_v47 }
 0x2a4   : > { %v422_v53 = vpop.permute.xlu0 %421  ;;  %v427_v55 = vpop.permute.xlu1 %426 }
 0x2a5   : > { %v429_v56 = vmul.f32 %v422_v53, %v417_v52  ;;  %v430_v58 = vmul.f32 %v427_v55, %v418_v54 }
 0x2a6   : > { %v491_v48 = vld [vmem:[#allocation3] sm:$0xff] }
 0x2a7   : > { %730 = vrcp.f32 %v491_v48 }
 0x2aa   : > { %v492_v49 = vld [vmem:[#allocation3 + $0x8] sm:$0xff] }
 0x2ab   : > { %732 = vrcp.f32 %v492_v49 }
 0x2b1   : > { %v731_v50 = vpop.eup %730 }
 0x2b2   : > { %499 = vperm.xlu0 %719, %v731_v50  }
 0x2b5   : > { %v733_v51 = vpop.eup %732 }
 0x2b6   : > { %504 = vperm.xlu0 %719, %v733_v51  }
 0x2e7   : > { %v475_v57 = vpop.f32.mrb[0].mxu1 }
 0x2e8   : > { %v482_v59 = vadd.f32 %v475_v57, %v429_v56  ;;  %v688_v60 = vpop.f32.mrb[1].mxu1 }
 0x2e9   : > { %v478_v61 = vpop.f32.mrb[2].mxu1 }
 0x2ea   : > { %484 = vst.msk [vmem:[#allocation4] sm:$0xff] %vm300_vm0, %v482_v59  ;;  %v483_v62 = vadd.f32 %v478_v61, %v430_v58  ;;  %v689_v63 = vpop.f32.mrb[3].mxu1 }
 0x2ec   : > { %485 = vst.msk [vmem:[#allocation4 + $0x8] sm:$0xff] %vm300_vm0, %v483_v62 }
 0x2f1   : > { %v495_v0 = vld [vmem:[#allocation4] sm:$0xff] }
 0x2f3   : > { %v496_v4 = vld [vmem:[#allocation4 + $0x8] sm:$0xff] }
 0x331   : > { %v500_v1 = vpop.permute.xlu0 %499 }
 0x332   : > { %v507_v2 = vmul.f32 %v500_v1, %v495_v0 }
 0x334   : > { %v672_v3 = vpack.c.bf16 %v507_v2, %v507_v2 }
 0x335   : > { %v505_v5 = vpop.permute.xlu0 %504 }
 0x336   : > { %518 = vst.msk [vmem:[%s287_s28] sm:$0xf] %vm517_vm4, %v672_v3  ;;  %v508_v6 = vmul.f32 %v505_v5, %v496_v4 }
 0x338   : > { %v673_v7 = vpack.c.bf16 %v508_v6, %v508_v6 }
 0x33a   : > { %519 = vst.msk [vmem:[%s287_s28 + $0x4] sm:$0xf] %vm517_vm4, %v673_v7 }
 0x33b PF: > { %s13_s14 = sadd.s32 1, %s756_s14   ;;  %s850_s12 = smov %s752_s13 }
 0x33c   : > { %p10_p5 = scmp.ge.s32.totalorder %s13_s14, 10   ;;  %s851_s13 = smov %s853_s15 }
 0x33e   :  { %12 = sbr.rel (!%p10_p5) target bundleno = 2 (0x2), region = 76 }

// kernel: videomae_classifier_forward.15
= control target key start
LH: loop header
LB: loop body
LE: loop exit
PB: predicated region body
PF: predicated region fallthrough
CT: control target
= control target key end

     0   :  { %vm22_vm0 = vcmask 261120   ;;  %v221_v1 = vmov 0.0   ;;  %vm171_vm1 = vcmask 257024   ;;  %s290_s1 = inlined_call_operand.vmem [shape: bf16[32,32], index: 1, kind: input, shape index: {}]   ;;  %s291_s0 = inlined_call_operand.vmem [shape: bf16[32,32], index: 0, kind: input, shape index: {}]   ;;  %s292_s3 = inlined_call_operand.vmem [shape: bf16[32,32], index: 3, kind: input, shape index: {}]   ;;  %s293_s2 = inlined_call_operand.vmem [shape: f32[1,32], index: 2, kind: input, shape index: {}]   ;;  %s294_s4 = inlined_call_operand.vmem [shape: bf16[32,32], index: 4, kind: output, shape index: {}]  }
   0x1   :  { %v217_v0 = vld [vmem:[%s290_s1] sm:$0xff]   ;;  %25 = vst.msk [vmem:[#allocation2 + $0x10] sm:$0xff] %vm22_vm0, %v221_v1  ;;  %23 = vst.msk [vmem:[#allocation2] sm:$0xff] %vm22_vm0, %v221_v1  ;;  %v218_v2 = vld [vmem:[%s290_s1 + $0x8] sm:$0xff]  }
   0x2   :  { %24 = vst.msk [vmem:[#allocation2 + $0x8] sm:$0xff] %vm22_vm0, %v221_v1  ;;  %26 = vst.msk [vmem:[#allocation2 + $0x18] sm:$0xff] %vm22_vm0, %v221_v1  ;;  %208 = vmatprep.subr.bf16.mxu0 %v217_v0  ;;  %v219_v3 = vld [vmem:[%s291_s0] sm:$0xff]   ;;  %v220_v4 = vld [vmem:[%s291_s0 + $0x8] sm:$0xff]  }
   0x3   :  { %209 = vmatpush3.bf16.msra.mxu0 %v217_v0  ;;  %212 = vmatprep.mubr.msk.bf16.mxu0 %vm22_vm0, %v219_v3  ;;  %v203_v17 = vld [vmem:[%s292_s3 + $0x8] sm:$0xff]   ;;  %v196_v18 = vld [vmem:[%s292_s3] sm:$0xff]  }
   0x4   :  { %210 = vmatprep.subr.bf16.mxu0 %v218_v2  ;;  %v186_v19 = vld [vmem:[%s293_s2] ss:$0 sm:$0xff]  ;;  %v201_v20 = vunpack.c.l.bf16 %v203_v17  ;;  %v197_v22 = vunpack.c.l.bf16 %v196_v18  ;;  %v202_v25 = vunpack.c.h.bf16 %v203_v17  ;;  %v198_v28 = vunpack.c.h.bf16 %v196_v18 }
   0x7   :  { %211 = vmatpush3.bf16.msra.mxu0 %v218_v2 }
   0x8   :  { %v29_v5 = vld [vmem:[#allocation2 + $0x10] sm:$0xff]  ;;  %v27_v6 = vld [vmem:[#allocation2] sm:$0xff] }
   0x9   :  { %v30_v8 = vld [vmem:[#allocation2 + $0x18] sm:$0xff]  ;;  %v28_v11 = vld [vmem:[#allocation2 + $0x8] sm:$0xff] }
   0xa   :  { %213 = vmatmul.mubr.msk.bf16.vlgmr.msra.gmra.mrb[0].mxu0 %vm22_vm0, %v220_v4 }
  0xdd   :  { %v214_v7 = vpop.f32.mrb[0].mxu0 }
  0xde   :  { %v119_v9 = vadd.f32 %v214_v7, %v29_v5  ;;  %v102_v10 = vpop.f32.mrb[1].mxu0 }
  0xdf   :  { %v117_v12 = vadd.f32 %v102_v10, %v27_v6  ;;  %v215_v13 = vpop.f32.mrb[2].mxu0 }
  0xe0   :  { %123 = vst.msk [vmem:[#allocation2 + $0x10] sm:$0xff] %vm22_vm0, %v119_v9  ;;  %v120_v14 = vadd.f32 %v215_v13, %v30_v8  ;;  %v105_v15 = vpop.f32.mrb[3].mxu0 }
  0xe1   :  { %121 = vst.msk [vmem:[#allocation2] sm:$0xff] %vm22_vm0, %v117_v12  ;;  %v118_v16 = vadd.f32 %v105_v15, %v28_v11 }
  0xe2   :  { %124 = vst.msk [vmem:[#allocation2 + $0x18] sm:$0xff] %vm22_vm0, %v120_v14 }
  0xe3   :  { %122 = vst.msk [vmem:[#allocation2 + $0x8] sm:$0xff] %vm22_vm0, %v118_v16 }
  0xe7   :  { %v130_v21 = vld [vmem:[#allocation2 + $0x10] sm:$0xff] }
  0xe8   :  { %v141_v23 = vadd.f32 %v186_v19, %v130_v21  ;;  %v128_v24 = vld [vmem:[#allocation2] sm:$0xff] }
  0xe9   :  { %v139_v26 = vadd.f32 %v186_v19, %v128_v24  ;;  %v131_v27 = vld [vmem:[#allocation2 + $0x18] sm:$0xff] }
  0xea   :  { %v153_v29 = vadd.f32 %v201_v20, %v141_v23  ;;  %v142_v30 = vadd.f32 %v186_v19, %v131_v27  ;;  %v129_v31 = vld [vmem:[#allocation2 + $0x8] sm:$0xff] }
  0xeb   :  { %v151_v32 = vadd.f32 %v197_v22, %v139_v26  ;;  %v140_v33 = vadd.f32 %v186_v19, %v129_v31 }
  0xec   :  { %v193_v34 = vpack.c.bf16 %v153_v29, %v153_v29  ;;  %v154_v35 = vadd.f32 %v202_v25, %v142_v30 }
  0xed   :  { %v191_v36 = vpack.c.bf16 %v151_v32, %v151_v32  ;;  %v152_v37 = vadd.f32 %v198_v28, %v140_v33 }
  0xee   :  { %174 = vst.msk [vmem:[%s294_s4 + $0x8] sm:$0xf] %vm171_vm1, %v193_v34  ;;  %v194_v38 = vpack.c.bf16 %v154_v35, %v154_v35 }
  0xef   :  { %172 = vst.msk [vmem:[%s294_s4] sm:$0xf] %vm171_vm1, %v191_v36  ;;  %v192_v39 = vpack.c.bf16 %v152_v37, %v152_v37 }
  0xf0   :  { %175 = vst.msk [vmem:[%s294_s4 + $0xc] sm:$0xf] %vm171_vm1, %v194_v38 }
  0xf1   :  { %173 = vst.msk [vmem:[%s294_s4 + $0x4] sm:$0xf] %vm171_vm1, %v192_v39 }

// kernel: videomae_classifier_forward.16
= control target key start
LH: loop header
LB: loop body
LE: loop exit
PB: predicated region body
PF: predicated region fallthrough
CT: control target
= control target key end

     0   :  { %vm33_vm0 = vcmask 261120   ;;  %vm246_vm1 = vcmask 519168   ;;  %s384_s0 = inlined_call_operand.vmem [shape: bf16[32,32], index: 0, kind: input, shape index: {}]   ;;  %s385_s3 = inlined_call_operand.vmem [shape: bf16[32,64], index: 3, kind: input, shape index: {}]   ;;  %s386_s1 = inlined_call_operand.vmem [shape: f32[1,32], index: 1, kind: input, shape index: {}]   ;;  %s387_s2 = inlined_call_operand.vmem [shape: f32[1,32], index: 2, kind: input, shape index: {}]   ;;  %s388_s4 = inlined_call_operand.vmem [shape: f32[1,64], index: 4, kind: input, shape index: {}]   ;;  %s389_s5 = inlined_call_operand.vmem [shape: bf16[32,64], index: 5, kind: output, shape index: {}]  }
   0x1   :  { %v271_v0 = vld [vmem:[%s384_s0] sm:$0xff]   ;;  %v278_v1 = vld [vmem:[%s384_s0 + $0x8] sm:$0xff]  }
   0x2   :  { %v272_v2 = vunpack.c.l.bf16 %v271_v0  ;;  %v276_v3 = vunpack.c.l.bf16 %v278_v1  ;;  %v273_v4 = vunpack.c.h.bf16 %v271_v0  ;;  %v277_v5 = vunpack.c.h.bf16 %v278_v1  ;;  %v291_v30 = vld [vmem:[%s385_s3] sm:$0xff]   ;;  %v292_v31 = vld [vmem:[%s385_s3 + $0x8] sm:$0xff]  }
   0x3   :  { %283 = vmatprep.subr.bf16.mxu0 %v291_v30  ;;  %v255_v46 = vld [vmem:[%s386_s1] ss:$0 sm:$0xff] }
   0x4   :  { %v34_v6 = vsel %vm33_vm0, %v272_v2, 0.0  ;;  %v40_v7 = vsel %vm33_vm0, %v276_v3, 0.0  ;;  %v37_v8 = vsel %vm33_vm0, %v273_v4, 0.0  ;;  %v43_v9 = vsel %vm33_vm0, %v277_v5, 0.0  ;;  %284 = vmatpush3.bf16.msra.mxu0 %v291_v30  ;;  %v256_v51 = vld [vmem:[%s387_s2] ss:$0 sm:$0xff] }
   0x5   :  { %35 = vadd.xlane.f32.xlu0 %v34_v6  ;;  %41 = vadd.xlane.f32.xlu1 %v40_v7 }
   0x6   :  { %285 = vmatprep.subr.bf16.mxu0 %v292_v31 }
   0x8   :  { %286 = vmatpush3.bf16.msra.mxu0 %v292_v31 }
   0x9   :  { %38 = vadd.xlane.f32.xlu0 %v37_v8  ;;  %44 = vadd.xlane.f32.xlu1 %v43_v9 }
  0x92   :  { %v36_v10 = vpop.xlane.xlu0 %35  ;;  %v42_v11 = vpop.xlane.xlu1 %41 }
  0x93   :  { %v47_v12 = vmul.f32 0.03125, %v36_v10  ;;  %v49_v13 = vmul.f32 0.03125, %v42_v11 }
  0x95   :  { %v51_v14 = vsub.f32 %v272_v2, %v47_v12  ;;  %v53_v15 = vsub.f32 %v276_v3, %v49_v13  ;;  %v257_v2 = vld [vmem:[%s388_s4] ss:$0 sm:$0xff] }
  0x96   :  { %v39_v16 = vpop.xlane.xlu0 %38  ;;  %v45_v17 = vpop.xlane.xlu1 %44 }
  0x97   :  { %v48_v18 = vmul.f32 0.03125, %v39_v16  ;;  %v50_v19 = vmul.f32 0.03125, %v45_v17  ;;  %v55_v20 = vmul.f32 %v51_v14, %v51_v14  ;;  %v57_v21 = vmul.f32 %v53_v15, %v53_v15 }
  0x99   :  { %v52_v22 = vsub.f32 %v273_v4, %v48_v18  ;;  %v54_v23 = vsub.f32 %v277_v5, %v50_v19  ;;  %v59_v24 = vsel %vm33_vm0, %v55_v20, 0.0  ;;  %v65_v25 = vsel %vm33_vm0, %v57_v21, 0.0 }
  0x9a   :  { %60 = vadd.xlane.f32.xlu0 %v59_v24 }
  0x9b   :  { %v56_v26 = vmul.f32 %v52_v22, %v52_v22  ;;  %v58_v27 = vmul.f32 %v54_v23, %v54_v23 }
  0x9d   :  { %v62_v28 = vsel %vm33_vm0, %v56_v26, 0.0  ;;  %v68_v29 = vsel %vm33_vm0, %v58_v27, 0.0 }
  0x9e   :  { %66 = vadd.xlane.f32.xlu0 %v65_v25  ;;  %63 = vadd.xlane.f32.xlu1 %v62_v28 }
  0xa2   :  { %69 = vadd.xlane.f32.xlu1 %v68_v29 }
 0x127   :  { %v61_v32 = vpop.xlane.xlu0 %60 }
 0x128   :  { %v71_v33 = vmul.f32 0.03125, %v61_v32 }
 0x12a   :  { %v75_v34 = vadd.f32 1e-06, %v71_v33 }
 0x12b   :  { %v64_v35 = vpop.xlane.xlu1 %63  ;;  %v67_v36 = vpop.xlane.xlu0 %66 }
 0x12c   :  { %293 = vrsqrt.f32 %v75_v34  ;;  %v72_v37 = vmul.f32 0.03125, %v64_v35  ;;  %v73_v38 = vmul.f32 0.03125, %v67_v36 }
 0x12e   :  { %v76_v39 = vadd.f32 1e-06, %v72_v37  ;;  %v77_v40 = vadd.f32 1e-06, %v73_v38 }
 0x12f   :  { %v70_v41 = vpop.xlane.xlu1 %69 }
 0x130   :  { %295 = vrsqrt.f32 %v76_v39  ;;  %v74_v42 = vmul.f32 0.03125, %v70_v41 }
 0x131   :  { %297 = vrsqrt.f32 %v77_v40 }
 0x132   :  { %v78_v43 = vadd.f32 1e-06, %v74_v42 }
 0x134   :  { %299 = vrsqrt.f32 %v78_v43 }
 0x136   :  { %v294_v44 = vpop.eup %293 }
 0x137   :  { %v83_v45 = vmul.f32 %v294_v44, %v51_v14 }
 0x139   :  { %v94_v49 = vmul.f32 %v255_v46, %v83_v45 }
 0x13a   :  { %v296_v47 = vpop.eup %295 }
 0x13b   :  { %v298_v48 = vpop.eup %297  ;;  %v84_v50 = vmul.f32 %v296_v47, %v52_v22  ;;  %v105_v55 = vadd.f32 %v256_v51, %v94_v49 }
 0x13c   :  { %v85_v52 = vmul.f32 %v298_v48, %v53_v15 }
 0x13d   :  { %v95_v53 = vmul.f32 %v255_v46, %v84_v50 }
 0x13e   :  { %v300_v54 = vpop.eup %299  ;;  %v96_v57 = vmul.f32 %v255_v46, %v85_v52 }
 0x13f   :  { %v106_v56 = vadd.f32 %v256_v51, %v95_v53  ;;  %v86_v58 = vmul.f32 %v300_v54, %v54_v23 }
 0x140   :  { %v107_v61 = vadd.f32 %v256_v51, %v96_v57 }
 0x141   :  { %v109_v59 = vpack.c.bf16 %v106_v56, %v105_v55  ;;  %v97_v60 = vmul.f32 %v255_v46, %v86_v58 }
 0x143   :  { %111 = vst.msk [vmem:[#allocation2] sm:$0xff] %vm33_vm0, %v109_v59  ;;  %v108_v62 = vadd.f32 %v256_v51, %v97_v60 }
 0x145   :  { %v110_v63 = vpack.c.bf16 %v108_v62, %v107_v61 }
 0x147   :  { %112 = vst.msk [vmem:[#allocation2 + $0x8] sm:$0xff] %vm33_vm0, %v110_v63 }
 0x14a   :  { %v113_v0 = vld [vmem:[#allocation2] sm:$0xff] }
 0x14b   :  { %287 = vmatprep.mubr.msk.bf16.mxu0 %vm33_vm0, %v113_v0 }
 0x14e   :  { %v114_v1 = vld [vmem:[#allocation2 + $0x8] sm:$0xff] }
 0x14f   :  { %288 = vmatmul.mubr.msk.bf16.vlgmr.msra.gmra.mrb[0].mxu0 %vm33_vm0, %v114_v1 }
 0x222   :  { %v289_v3 = vpop.f32.mrb[0].mxu0 }
 0x223   :  { %v188_v4 = vadd.f32 %v289_v3, %v257_v2  ;;  %v179_v5 = vpop.f32.mrb[1].mxu0 }
 0x224   :  { %v180_v6 = vadd.f32 %v257_v2, %v179_v5  ;;  %v290_v7 = vpop.f32.mrb[2].mxu0 }
 0x225   :  { %v196_v8 = vmul.f32 %v188_v4, %v188_v4  ;;  %v191_v9 = vadd.f32 %v290_v7, %v257_v2  ;;  %v182_v10 = vpop.f32.mrb[3].mxu0 }
 0x226   :  { %v194_v11 = vmul.f32 %v180_v6, %v180_v6  ;;  %v183_v12 = vadd.f32 %v257_v2, %v182_v10 }
 0x227   :  { %v200_v13 = vmul.f32 %v196_v8, %v188_v4  ;;  %v197_v14 = vmul.f32 %v191_v9, %v191_v9 }
 0x228   :  { %v198_v15 = vmul.f32 %v194_v11, %v180_v6  ;;  %v195_v16 = vmul.f32 %v183_v12, %v183_v12 }
 0x229   :  { %v204_v17 = vmul.f32 0.044715, %v200_v13  ;;  %v201_v18 = vmul.f32 %v197_v14, %v191_v9 }
 0x22a   :  { %v202_v19 = vmul.f32 0.044715, %v198_v15  ;;  %v199_v20 = vmul.f32 %v195_v16, %v183_v12 }
 0x22b   :  { %v208_v21 = vadd.f32 %v204_v17, %v188_v4  ;;  %v205_v22 = vmul.f32 0.044715, %v201_v18 }
 0x22c   :  { %v206_v23 = vadd.f32 %v202_v19, %v180_v6  ;;  %v203_v24 = vmul.f32 0.044715, %v199_v20 }
 0x22d   :  { %v212_v25 = vmul.f32 0.7978846, %v208_v21  ;;  %v209_v26 = vadd.f32 %v205_v22, %v191_v9 }
 0x22e   :  { %v210_v27 = vmul.f32 0.7978846, %v206_v23  ;;  %v207_v28 = vadd.f32 %v203_v24, %v183_v12 }
 0x22f   :  { %301 = vtanh.f32 %v212_v25  ;;  %v213_v29 = vmul.f32 0.7978846, %v209_v26 }
 0x230   :  { %303 = vtanh.f32 %v210_v27  ;;  %v211_v30 = vmul.f32 0.7978846, %v207_v28 }
 0x231   :  { %305 = vtanh.f32 %v213_v29 }
 0x232   :  { %307 = vtanh.f32 %v211_v30 }
 0x239   :  { %v302_v31 = vpop.eup %301 }
 0x23a   :  { %v304_v32 = vpop.eup %303  ;;  %v220_v33 = vadd.f32 1.0, %v302_v31 }
 0x23b   :  { %v306_v34 = vpop.eup %305  ;;  %v218_v35 = vadd.f32 1.0, %v304_v32 }
 0x23c   :  { %v308_v36 = vpop.eup %307  ;;  %v224_v37 = vmul.f32 0.5, %v220_v33  ;;  %v221_v38 = vadd.f32 1.0, %v306_v34 }
 0x23d   :  { %v222_v39 = vmul.f32 0.5, %v218_v35  ;;  %v219_v40 = vadd.f32 1.0, %v308_v36 }
 0x23e   :  { %v228_v41 = vmul.f32 %v224_v37, %v188_v4  ;;  %v225_v42 = vmul.f32 0.5, %v221_v38 }
 0x23f   :  { %v226_v43 = vmul.f32 %v222_v39, %v180_v6  ;;  %v223_v44 = vmul.f32 0.5, %v219_v40 }
 0x240   :  { %v268_v45 = vpack.c.bf16 %v228_v41, %v228_v41  ;;  %v229_v46 = vmul.f32 %v225_v42, %v191_v9 }
 0x241   :  { %v266_v47 = vpack.c.bf16 %v226_v43, %v226_v43  ;;  %v227_v48 = vmul.f32 %v223_v44, %v183_v12 }
 0x242   :  { %249 = vst.msk [vmem:[%s389_s5 + $0x8] sm:$0xf] %vm246_vm1, %v268_v45  ;;  %v269_v49 = vpack.c.bf16 %v229_v46, %v229_v46 }
 0x243   :  { %247 = vst.msk [vmem:[%s389_s5] sm:$0xf] %vm246_vm1, %v266_v47  ;;  %v267_v50 = vpack.c.bf16 %v227_v48, %v227_v48 }
 0x244   :  { %250 = vst.msk [vmem:[%s389_s5 + $0xc] sm:$0xf] %vm246_vm1, %v269_v49 }
 0x245   :  { %248 = vst.msk [vmem:[%s389_s5 + $0x4] sm:$0xf] %vm246_vm1, %v267_v50 }

// kernel: videomae_classifier_forward.23
= control target key start
LH: loop header
LB: loop body
LE: loop exit
PB: predicated region body
PF: predicated region fallthrough
CT: control target
= control target key end

     0   :  { %vm35_vm0 = vcmask 261120   ;;  %s402_s0 = inlined_call_operand.vmem [shape: bf16[2,16,32], index: 0, kind: input, shape index: {}]   ;;  %s403_s1 = inlined_call_operand.vmem [shape: f32[1,1,32], index: 1, kind: input, shape index: {}]   ;;  %s404_s2 = inlined_call_operand.vmem [shape: f32[1,1,32], index: 2, kind: input, shape index: {}]   ;;  %s405_s3 = inlined_call_operand.vmem [shape: f32[32,2], index: 3, kind: input, shape index: {}]   ;;  %s406_s4 = inlined_call_operand.vmem [shape: f32[1,2], index: 4, kind: input, shape index: {}]   ;;  %s407_s5 = inlined_call_operand.hbm [shape: f32[2,2], index: 5, kind: output, shape index: {}]  }
   0x1   :  { %v248_v0 = vld [vmem:[%s402_s0] sm:$0xff]   ;;  %v255_v1 = vld [vmem:[%s402_s0 + $0x8] sm:$0xff]  }
   0x2   :  { %10 = vsyncpa [#allocation4], 0  ;;  %v249_v2 = vunpack.c.l.bf16 %v248_v0  ;;  %v253_v3 = vunpack.c.l.bf16 %v255_v1  ;;  %v250_v4 = vunpack.c.h.bf16 %v248_v0  ;;  %v254_v5 = vunpack.c.h.bf16 %v255_v1  ;;  %v143_v30 = vld [vmem:[%s405_s3] sm:$0xff]  ;;  %v144_v31 = vld [vmem:[%s405_s3 + $0x8] sm:$0xff]  ;;  %s317_s7 = smov [#allocation3]  }
   0x3   :  { %v145_v32 = vld [vmem:[%s405_s3 + $0x10] sm:$0xff]  ;;  %vm25_vm1 = vcmask 254976   ;;  %v314_v33 = vmov 0.0|0.0   ;;  %v273_v34 = vpack.c.bf16 %v144_v31, %v143_v30  ;;  %v146_v35 = vld [vmem:[%s405_s3 + $0x18] sm:$0xff]  ;;  %v315_v36 = vmov 0.0   ;;  %s235_s8 = sshll.u32 %s317_s7, 4  ;;  %s236_s8 = int_to_ptr.vmem [resolvable:$true] %s235_s8 }
   0x4   :  { %v36_v6 = vsel %vm35_vm0, %v249_v2, 0.0  ;;  %v42_v7 = vsel %vm35_vm0, %v253_v3, 0.0  ;;  %v39_v8 = vsel %vm35_vm0, %v250_v4, 0.0  ;;  %v45_v9 = vsel %vm35_vm0, %v254_v5, 0.0  ;;  %272 = vmatprep.subr.bf16.mxu0 %v314_v33  ;;  %26 = vst.msk [vmem:[#allocation2] sm:$0x3] %vm25_vm1, %v315_v36  ;;  %p295_p1 = scmp.lt.s32.totalorder %s236_s8, %s236_s8 }
   0x5   :  { %37 = vadd.xlane.f32.xlu0 %v36_v6  ;;  %43 = vadd.xlane.f32.xlu1 %v42_v7  ;;  %v276_v37 = vpack.c.bf16 %v146_v35, %v145_v32  ;;  %vm316_vm2 = vmmov 0   ;;  %v243_v51 = vld [vmem:[%s403_s1] ss:$0 sm:$0xff]  ;;  %vm132_vm3 = vcmask 1041409   ;;  %vm227_vm4 = vcmask 9216   ;;  %s290_s9 = scalar_lea.vmem %s236_s8, 32 }
   0x6   :  { %274 = vmatpush3.bf16.msra.mxu0 %v273_v34  ;;  %269 = vmatprep.mubr.msk.f32.mxu0 %vm316_vm2, %v315_v36  ;;  %v244_v55 = vld [vmem:[%s404_s2] ss:$0 sm:$0xff]  ;;  %p291_p0 = scmp.ne.s32.totalorder %s236_s8, %s290_s9  ;;  %p296_p2 = scmp.lt.s32.totalorder %s290_s9, %s290_s9 }
   0x7   :  { %275 = vmatprep.subr.bf16.mxu0 %v314_v33 }
   0x8   :  { %p297_p3 = por %p296_p2, %p295_p1 }
   0x9   :  { %40 = vadd.xlane.f32.xlu0 %v39_v8  ;;  %46 = vadd.xlane.f32.xlu1 %v45_v9 }
   0xa   :  { %277 = vmatpush3.bf16.msra.mxu0 %v276_v37  ;;  %p298_p4 = pnand %p297_p3, %p291_p0 }
  0x92   :  { %v38_v10 = vpop.xlane.xlu0 %37  ;;  %v44_v11 = vpop.xlane.xlu1 %43 }
  0x93   :  { %v49_v12 = vmul.f32 0.03125, %v38_v10  ;;  %v51_v13 = vmul.f32 0.03125, %v44_v11 }
  0x95   :  { %v53_v14 = vsub.f32 %v249_v2, %v49_v12  ;;  %v55_v15 = vsub.f32 %v253_v3, %v51_v13 }
  0x96   :  { %v41_v16 = vpop.xlane.xlu0 %40  ;;  %v47_v17 = vpop.xlane.xlu1 %46 }
  0x97   :  { %v50_v18 = vmul.f32 0.03125, %v41_v16  ;;  %v52_v19 = vmul.f32 0.03125, %v47_v17  ;;  %v57_v20 = vmul.f32 %v53_v14, %v53_v14  ;;  %v59_v21 = vmul.f32 %v55_v15, %v55_v15 }
  0x99   :  { %v54_v22 = vsub.f32 %v250_v4, %v50_v18  ;;  %v56_v23 = vsub.f32 %v254_v5, %v52_v19  ;;  %v61_v24 = vsel %vm35_vm0, %v57_v20, 0.0  ;;  %v67_v25 = vsel %vm35_vm0, %v59_v21, 0.0  ;;  %v111_v20 = vld [vmem:[#allocation2] sm:$0x3] }
  0x9a   :  { %62 = vadd.xlane.f32.xlu0 %v61_v24 }
  0x9b   :  { %v58_v26 = vmul.f32 %v54_v22, %v54_v22  ;;  %v60_v27 = vmul.f32 %v56_v23, %v56_v23 }
  0x9d   :  { %v64_v28 = vsel %vm35_vm0, %v58_v26, 0.0  ;;  %v70_v29 = vsel %vm35_vm0, %v60_v27, 0.0  ;;  %v245_v27 = vld [vmem:[%s406_s4] ss:$0 sm:$0xff] }
  0x9e   :  { %68 = vadd.xlane.f32.xlu0 %v67_v25  ;;  %65 = vadd.xlane.f32.xlu1 %v64_v28 }
  0xa2   :  { %71 = vadd.xlane.f32.xlu1 %v70_v29 }
 0x127   :  { %v63_v38 = vpop.xlane.xlu0 %62 }
 0x128   :  { %v73_v39 = vmul.f32 0.03125, %v63_v38 }
 0x12a   :  { %v77_v40 = vadd.f32 1e-06, %v73_v39 }
 0x12b   :  { %v66_v41 = vpop.xlane.xlu1 %65  ;;  %v69_v42 = vpop.xlane.xlu0 %68 }
 0x12c   :  { %282 = vrsqrt.f32 %v77_v40  ;;  %v74_v43 = vmul.f32 0.03125, %v66_v41  ;;  %v75_v44 = vmul.f32 0.03125, %v69_v42 }
 0x12e   :  { %v78_v45 = vadd.f32 1e-06, %v74_v43  ;;  %v79_v46 = vadd.f32 1e-06, %v75_v44 }
 0x12f   :  { %v72_v47 = vpop.xlane.xlu1 %71 }
 0x130   :  { %284 = vrsqrt.f32 %v78_v45  ;;  %v76_v48 = vmul.f32 0.03125, %v72_v47 }
 0x131   :  { %286 = vrsqrt.f32 %v79_v46 }
 0x132   :  { %v80_v49 = vadd.f32 1e-06, %v76_v48 }
 0x134   :  { %288 = vrsqrt.f32 %v80_v49 }
 0x136   :  { %v283_v50 = vpop.eup %282 }
 0x137   :  { %v85_v52 = vmul.f32 %v283_v50, %v53_v14 }
 0x139   :  { %v96_v53 = vmul.f32 %v243_v51, %v85_v52 }
 0x13a   :  { %v285_v54 = vpop.eup %284 }
 0x13b   :  { %v287_v56 = vpop.eup %286  ;;  %v86_v57 = vmul.f32 %v285_v54, %v54_v22  ;;  %v107_v59 = vadd.f32 %v244_v55, %v96_v53 }
 0x13c   :  { %v87_v58 = vmul.f32 %v287_v56, %v55_v15 }
 0x13d   :  { %v97_v60 = vmul.f32 %v243_v51, %v86_v57  ;;  %v112_v1 = vsel %vm35_vm0, %v107_v59, 0.0 }
 0x13e   :  { %v289_v61 = vpop.eup %288  ;;  %v98_v62 = vmul.f32 %v243_v51, %v87_v58 }
 0x13f   :  { %v108_v63 = vadd.f32 %v244_v55, %v97_v60  ;;  %v88_v0 = vmul.f32 %v289_v61, %v56_v23 }
 0x140   :  { %v109_v3 = vadd.f32 %v244_v55, %v98_v62 }
 0x141   :  { %v113_v2 = vsel %vm35_vm0, %v108_v63, 0.0  ;;  %v99_v4 = vmul.f32 %v243_v51, %v88_v0 }
 0x142   :  { %v114_v5 = vadd.f32 %v113_v2, %v112_v1  ;;  %v121_v8 = vsel %vm35_vm0, %v109_v3, 0.0 }
 0x143   :  { %v110_v6 = vadd.f32 %v244_v55, %v99_v4 }
 0x144   :  { %v115_v7 = vrot.slane %v114_v5, 4 }
 0x145   :  { %v122_v9 = vsel %vm35_vm0, %v110_v6, 0.0 }
 0x146   :  { %v123_v10 = vadd.f32 %v122_v9, %v121_v8  ;;  %v116_v11 = vadd.f32 %v115_v7, %v114_v5 }
 0x148   :  { %v124_v12 = vrot.slane %v123_v10, 4  ;;  %v117_v13 = vrot.slane %v116_v11, 2 }
 0x14a   :  { %v118_v14 = vadd.f32 %v117_v13, %v116_v11  ;;  %v125_v15 = vadd.f32 %v124_v12, %v123_v10 }
 0x14c   :  { %v126_v16 = vrot.slane %v125_v15, 2  ;;  %v119_v17 = vrot.slane %v118_v14, 1 }
 0x14e   :  { %v127_v18 = vadd.f32 %v126_v16, %v125_v15  ;;  %v120_v21 = vadd.f32 %v119_v17, %v118_v14 }
 0x150   :  { %v128_v19 = vrot.slane %v127_v18, 1 }
 0x152   :  { %v129_v22 = vadd.f32 %v128_v19, %v127_v18 }
 0x154   :  { %v133_v23 = vsel %vm132_vm3, %v129_v22, %v120_v21 }
 0x155   :  { %v135_v24 = vadd.f32 %v133_v23, %v111_v20 }
 0x157   :  { %137 = vst.msk [vmem:[#allocation2] sm:$0x3] %vm25_vm1, %v135_v24 }
 0x15e   :  { %v141_v25 = vld [vmem:[#allocation2] sm:$0x3] }
 0x15f   :  { %v142_v26 = vmul.f32 0.0625, %v141_v25 }
 0x161   :  { %270 = vmatmul.mubr.msk.f32.vlgmr.msra.gmra.mrb[0].mxu0 %vm35_vm0, %v142_v26 }
 0x234   :  { %v223_v28 = vpop.f32.mrb[0].mxu0 }
 0x235   :  { %v224_v29 = vadd.f32 %v245_v27, %v223_v28  ;;  %v271_v30 = vpop.f32.mrb[1].mxu0 }
 0x237   :  { %228 = vst.msk [vmem:[#allocation3] sm:$0x3] %vm227_vm4, %v224_v29 }
 0x238   :  { %301 = shalt.err (!%p298_p4)
}
 0x239   :  { %s302_s12 = scalar_lea.hbm %s407_s5, 32 }
 0x23a   :  { %p303_p5 = scmp.ne.s32.totalorder %s407_s5, %s302_s12  ;;  %p306_p6 = scmp.lt.u32.totalorder %s302_s12, %s407_s5 }
 0x23c   :  { %p308_p7 = pnand %p306_p6, %p303_p5 }
 0x23e   :  { %311 = shalt.err (!%p308_p7)
}
 0x23f   :  { %238 = dma.vmem_to_hbm [thread:$0]  %s236_s8, 32, %s407_s5, [#allocation4]  }
 0x240   :  { %312 = dma.done.wait [#allocation4], 32  }
 0x241   :  { %313 = vsyncadd [#allocation4], 4294967264 }
 0x242   :  { %242 = vsyncpa [#allocation4], 1 }

// kernel: videomae_classifier_forward.17
= control target key start
LH: loop header
LB: loop body
LE: loop exit
PB: predicated region body
PF: predicated region fallthrough
CT: control target
= control target key end

     0   :  { %vm22_vm0 = vcmask 261120   ;;  %v248_v1 = vmov 0.0   ;;  %vm77_vm1 = vcmask 523264   ;;  %vm188_vm2 = vcmask 257024   ;;  %s321_s1 = inlined_call_operand.vmem [shape: bf16[64,32], index: 1, kind: input, shape index: {}]   ;;  %s322_s0 = inlined_call_operand.vmem [shape: bf16[32,64], index: 0, kind: input, shape index: {}]   ;;  %s323_s3 = inlined_call_operand.vmem [shape: bf16[32,32], index: 3, kind: input, shape index: {}]   ;;  %s324_s2 = inlined_call_operand.vmem [shape: f32[1,32], index: 2, kind: input, shape index: {}]   ;;  %s325_s4 = inlined_call_operand.vmem [shape: bf16[32,32], index: 4, kind: output, shape index: {}]  }
   0x1   :  { %v242_v0 = vld [vmem:[%s321_s1] sm:$0xff]   ;;  %25 = vst.msk [vmem:[#allocation2 + $0x10] sm:$0xff] %vm22_vm0, %v248_v1  ;;  %23 = vst.msk [vmem:[#allocation2] sm:$0xff] %vm22_vm0, %v248_v1  ;;  %v243_v2 = vld [vmem:[%s321_s1 + $0x8] sm:$0xff]  }
   0x2   :  { %24 = vst.msk [vmem:[#allocation2 + $0x8] sm:$0xff] %vm22_vm0, %v248_v1  ;;  %26 = vst.msk [vmem:[#allocation2 + $0x18] sm:$0xff] %vm22_vm0, %v248_v1  ;;  %229 = vmatprep.subr.bf16.mxu0 %v242_v0  ;;  %v244_v3 = vld [vmem:[%s321_s1 + $0x10] sm:$0xff]   ;;  %v246_v4 = vld [vmem:[%s322_s0] sm:$0xff]  }
   0x3   :  { %230 = vmatpush3.bf16.msra.mxu0 %v242_v0  ;;  %237 = vmatprep.mubr.msk.bf16.mxu0 %vm77_vm1, %v246_v4  ;;  %v245_v5 = vld [vmem:[%s321_s1 + $0x18] sm:$0xff]   ;;  %v247_v6 = vld [vmem:[%s322_s0 + $0x8] sm:$0xff]   ;;  %v215_v20 = vld [vmem:[%s323_s3] sm:$0xff]  }
   0x4   :  { %231 = vmatprep.subr.bf16.mxu0 %v243_v2  ;;  %v222_v19 = vld [vmem:[%s323_s3 + $0x8] sm:$0xff]   ;;  %v205_v21 = vld [vmem:[%s324_s2] ss:$0 sm:$0xff]  ;;  %v216_v24 = vunpack.c.l.bf16 %v215_v20  ;;  %v217_v30 = vunpack.c.h.bf16 %v215_v20 }
   0x5   :  { %v220_v22 = vunpack.c.l.bf16 %v222_v19  ;;  %v221_v27 = vunpack.c.h.bf16 %v222_v19 }
   0x7   :  { %232 = vmatpush3.bf16.msra.mxu0 %v243_v2 }
   0x8   :  { %233 = vmatprep.subr.bf16.mxu0 %v244_v3  ;;  %v29_v7 = vld [vmem:[#allocation2 + $0x10] sm:$0xff]  ;;  %v27_v8 = vld [vmem:[#allocation2] sm:$0xff] }
   0x9   :  { %v30_v10 = vld [vmem:[#allocation2 + $0x18] sm:$0xff]  ;;  %v28_v13 = vld [vmem:[#allocation2 + $0x8] sm:$0xff] }
   0xb   :  { %234 = vmatpush3.bf16.msra.mxu0 %v244_v3 }
   0xc   :  { %235 = vmatprep.subr.bf16.mxu0 %v245_v5 }
   0xf   :  { %236 = vmatpush3.bf16.msra.mxu0 %v245_v5 }
  0x12   :  { %238 = vmatmul.mubr.msk.bf16.vlgmr.msra.gmra.mrb[0].mxu0 %vm77_vm1, %v247_v6 }
  0xe5   :  { %v239_v9 = vpop.f32.mrb[0].mxu0 }
  0xe6   :  { %v135_v11 = vadd.f32 %v239_v9, %v29_v7  ;;  %v118_v12 = vpop.f32.mrb[1].mxu0 }
  0xe7   :  { %v133_v14 = vadd.f32 %v118_v12, %v27_v8  ;;  %v240_v15 = vpop.f32.mrb[2].mxu0 }
  0xe8   :  { %140 = vst.msk [vmem:[#allocation2 + $0x10] sm:$0xff] %vm22_vm0, %v135_v11  ;;  %v136_v16 = vadd.f32 %v240_v15, %v30_v10  ;;  %v121_v17 = vpop.f32.mrb[3].mxu0 }
  0xe9   :  { %138 = vst.msk [vmem:[#allocation2] sm:$0xff] %vm22_vm0, %v133_v14  ;;  %v134_v18 = vadd.f32 %v121_v17, %v28_v13 }
  0xea   :  { %141 = vst.msk [vmem:[#allocation2 + $0x18] sm:$0xff] %vm22_vm0, %v136_v16 }
  0xeb   :  { %139 = vst.msk [vmem:[#allocation2 + $0x8] sm:$0xff] %vm22_vm0, %v134_v18 }
  0xef   :  { %v147_v23 = vld [vmem:[#allocation2 + $0x10] sm:$0xff] }
  0xf0   :  { %v158_v25 = vadd.f32 %v205_v21, %v147_v23  ;;  %v145_v26 = vld [vmem:[#allocation2] sm:$0xff] }
  0xf1   :  { %v156_v28 = vadd.f32 %v205_v21, %v145_v26  ;;  %v148_v29 = vld [vmem:[#allocation2 + $0x18] sm:$0xff] }
  0xf2   :  { %v170_v31 = vadd.f32 %v220_v22, %v158_v25  ;;  %v159_v32 = vadd.f32 %v205_v21, %v148_v29  ;;  %v146_v33 = vld [vmem:[#allocation2 + $0x8] sm:$0xff] }
  0xf3   :  { %v168_v34 = vadd.f32 %v216_v24, %v156_v28  ;;  %v157_v35 = vadd.f32 %v205_v21, %v146_v33 }
  0xf4   :  { %v212_v36 = vpack.c.bf16 %v170_v31, %v170_v31  ;;  %v171_v37 = vadd.f32 %v221_v27, %v159_v32 }
  0xf5   :  { %v210_v38 = vpack.c.bf16 %v168_v34, %v168_v34  ;;  %v169_v39 = vadd.f32 %v217_v30, %v157_v35 }
  0xf6   :  { %191 = vst.msk [vmem:[%s325_s4 + $0x8] sm:$0xf] %vm188_vm2, %v212_v36  ;;  %v213_v40 = vpack.c.bf16 %v171_v37, %v171_v37 }
  0xf7   :  { %189 = vst.msk [vmem:[%s325_s4] sm:$0xf] %vm188_vm2, %v210_v38  ;;  %v211_v41 = vpack.c.bf16 %v169_v39, %v169_v39 }
  0xf8   :  { %192 = vst.msk [vmem:[%s325_s4 + $0xc] sm:$0xf] %vm188_vm2, %v213_v40 }
  0xf9   :  { %190 = vst.msk [vmem:[%s325_s4 + $0x4] sm:$0xf] %vm188_vm2, %v211_v41 }

</bundles_post_ra>
